<compile_context>
chip_gen: v7x
topology: tpu7x:2x2x1
jax: 0.10.0
libtpu: 0.0.40
codegen_flags: <defaults>
</compile_context>

<pallas_src>
import functools
import math

import jax
import jax.numpy as jnp
from jax import lax
from jax.experimental import pallas as pl
from jax.experimental.pallas import tpu as pltpu

_VMEM_LIMIT = 64 * 1024 * 1024  # <= v7x physical VMEM; plenty on v5e/v6e


def _fit(dim, target, align):
    """Largest tile <= target that divides dim and is a multiple of `align`
    (falls back to the full dim if dim <= target or no aligned divisor)."""
    if dim <= target:
        return dim
    best = dim
    t = align
    while t <= target:
        if dim % t == 0:
            best = t
        t += align
    return best


def _cparams(*sem):
    return pltpu.CompilerParams(dimension_semantics=sem,
                                vmem_limit_bytes=_VMEM_LIMIT)


# ----------------------------- Pallas kernels ------------------------------

def _matmul_kernel(x_ref, w_ref, b_ref, o_ref, acc_ref):
    """Tiled x@w + b with f32 VMEM accumulator (grid: M, N, K-reduction)."""
    @pl.when(pl.program_id(2) == 0)
    def _init():
        acc_ref[...] = jnp.zeros_like(acc_ref)

    acc_ref[...] += jnp.dot(x_ref[...], w_ref[...],
                            preferred_element_type=jnp.float32)

    @pl.when(pl.program_id(2) == pl.num_programs(2) - 1)
    def _store():
        o_ref[...] = (acc_ref[...] + b_ref[...].astype(jnp.float32)
                      ).astype(o_ref.dtype)


def _matmul_add_ln_kernel(x_ref, w_ref, b_ref, r_ref, g_ref, be_ref,
                          o_ref, acc_ref, *, eps):
    """(x@w + b + residual) -> LayerNorm, fused into the last-K epilogue."""
    k = pl.program_id(1)

    @pl.when(k == 0)
    def _init():
        acc_ref[...] = jnp.zeros_like(acc_ref)

    acc_ref[...] += jnp.dot(x_ref[...], w_ref[...],
                            preferred_element_type=jnp.float32)

    @pl.when(k == pl.num_programs(1) - 1)
    def _store():
        y = (acc_ref[...] + b_ref[...].astype(jnp.float32)
             + r_ref[...].astype(jnp.float32))
        mu = jnp.mean(y, axis=-1, keepdims=True)
        var = jnp.mean(jnp.square(y - mu), axis=-1, keepdims=True)
        yn = (y - mu) * lax.rsqrt(var + eps)
        o_ref[...] = (yn * g_ref[...] + be_ref[...]).astype(o_ref.dtype)


def _ffn_add_ln_kernel(x_ref, w1_ref, b1_ref, w2_ref, b2_ref, g_ref, be_ref,
                       o_ref, acc_ref, *, eps):
    """LayerNorm(x + relu(x@w1+b1)@w2 + b2); hidden never touches HBM,
    residual add + LN fused into the last dim_ff-step epilogue."""
    f = pl.program_id(1)

    @pl.when(f == 0)
    def _init():
        acc_ref[...] = jnp.zeros_like(acc_ref)

    h = jnp.dot(x_ref[...], w1_ref[...], preferred_element_type=jnp.float32)
    h = jnp.maximum(h + b1_ref[...].astype(jnp.float32), 0.0)
    acc_ref[...] += jnp.dot(h.astype(w2_ref.dtype), w2_ref[...],
                            preferred_element_type=jnp.float32)

    @pl.when(f == pl.num_programs(1) - 1)
    def _store():
        y = (acc_ref[...] + b2_ref[...].astype(jnp.float32)
             + x_ref[...].astype(jnp.float32))           # x is the residual
        mu = jnp.mean(y, axis=-1, keepdims=True)
        var = jnp.mean(jnp.square(y - mu), axis=-1, keepdims=True)
        yn = (y - mu) * lax.rsqrt(var + eps)
        o_ref[...] = (yn * g_ref[...] + be_ref[...]).astype(o_ref.dtype)


def _ln_kernel(x_ref, g_ref, b_ref, o_ref, *, eps):
    x = x_ref[...].astype(jnp.float32)
    mu = jnp.mean(x, axis=-1, keepdims=True)
    var = jnp.mean(jnp.square(x - mu), axis=-1, keepdims=True)
    xn = (x - mu) * lax.rsqrt(var + eps)
    o_ref[...] = (xn * g_ref[...] + b_ref[...]).astype(o_ref.dtype)


def _attn_kernel(q_ref, kv_ref, m_ref, o_ref, *, nhead, scale):
    """One (batch, q-tile) step over all heads.
    q_ref: (1, tq, D), kv_ref: (1, S, 2D) fused K|V, m_ref: (tq, S) additive."""
    D = q_ref.shape[-1]
    dh = D // nhead
    mask = m_ref[...]                                      # (tq, S) f32
    outs = []
    for h in range(nhead):
        lo = h * dh
        # per-head REF slices: never materialize the whole (S, 2D) block
        q = (q_ref[0, :, pl.ds(lo, dh)] * scale).astype(kv_ref.dtype)
        k = kv_ref[0, :, pl.ds(lo, dh)]                    # (S, dh)
        v = kv_ref[0, :, pl.ds(D + lo, dh)]                # (S, dh)
        # q @ k^T via trans-B contraction (no explicit k.T relayout)
        s = lax.dot_general(q, k, (((1,), (1,)), ((), ())),
                            preferred_element_type=jnp.float32)  # (tq, S)
        s = s + mask
        s = s - jnp.max(s, axis=-1, keepdims=True)
        p = jnp.exp(s)
        p = p * pl.reciprocal(jnp.sum(p, axis=-1, keepdims=True), approx=True)
        outs.append(jnp.dot(p.astype(v.dtype), v,
                            preferred_element_type=jnp.float32))
    # single lane-dense full-width store (no per-head masked partial stores)
    o_ref[0] = jnp.concatenate(outs, axis=-1).astype(o_ref.dtype)


# ------------------------------ Wrappers ------------------------------------

def matmul(x, w, b, out_dtype=jnp.bfloat16, tm=256, tn=256, tk=512):
    """x: (M, K) bf16, w: (K, N) bf16, b: (1, N) f32 -> (M, N)."""
    M, K = x.shape
    N = w.shape[1]
    tm, tn, tk = _fit(M, tm, 8), _fit(N, tn, 128), _fit(K, tk, 128)
    return pl.pallas_call(
        _matmul_kernel,
        out_shape=jax.ShapeDtypeStruct((M, N), out_dtype),
        grid=(M // tm, N // tn, K // tk),
        in_specs=[
            pl.BlockSpec((tm, tk), lambda i, j, k: (i, k)),
            pl.BlockSpec((tk, tn), lambda i, j, k: (k, j)),
            pl.BlockSpec((1, tn), lambda i, j, k: (0, j)),
        ],
        out_specs=pl.BlockSpec((tm, tn), lambda i, j, k: (i, j)),
        scratch_shapes=[pltpu.VMEM((tm, tn), jnp.float32)],
        compiler_params=_cparams("parallel", "parallel", "arbitrary"),
    )(x, w, b)


def matmul_add_ln(x, w, b, res, gamma, beta, eps=1e-5,
                  out_dtype=jnp.bfloat16, tm=256, tk=512):
    """LayerNorm(res + x@w + b); output width = full N (LN needs the row)."""
    M, K = x.shape
    N = w.shape[1]
    tm, tk = _fit(M, tm, 8), _fit(K, tk, 128)
    return pl.pallas_call(
        functools.partial(_matmul_add_ln_kernel, eps=eps),
        out_shape=jax.ShapeDtypeStruct((M, N), out_dtype),
        grid=(M // tm, K // tk),
        in_specs=[
            pl.BlockSpec((tm, tk), lambda i, k: (i, k)),
            pl.BlockSpec((tk, N), lambda i, k: (k, 0)),
            pl.BlockSpec((1, N), lambda i, k: (0, 0)),
            pl.BlockSpec((tm, N), lambda i, k: (i, 0)),   # residual, resident over k
            pl.BlockSpec((1, N), lambda i, k: (0, 0)),
            pl.BlockSpec((1, N), lambda i, k: (0, 0)),
        ],
        out_specs=pl.BlockSpec((tm, N), lambda i, k: (i, 0)),
        scratch_shapes=[pltpu.VMEM((tm, N), jnp.float32)],
        compiler_params=_cparams("parallel", "arbitrary"),
    )(x, w, b, res, gamma, beta)


def ffn_add_ln(x, w1, b1, w2, b2, gamma, beta, eps=1e-5,
               out_dtype=jnp.bfloat16, tm=256, tf=256):
    """LayerNorm(x + relu(x@w1+b1)@w2 + b2), all fused (x is the residual)."""
    M, D = x.shape
    F = w1.shape[1]
    tm, tf = _fit(M, tm, 8), _fit(F, tf, 128)
    return pl.pallas_call(
        functools.partial(_ffn_add_ln_kernel, eps=eps),
        out_shape=jax.ShapeDtypeStruct((M, D), out_dtype),
        grid=(M // tm, F // tf),
        in_specs=[
            pl.BlockSpec((tm, D), lambda i, f: (i, 0)),    # resident over f
            pl.BlockSpec((D, tf), lambda i, f: (0, f)),
            pl.BlockSpec((1, tf), lambda i, f: (0, f)),
            pl.BlockSpec((tf, D), lambda i, f: (f, 0)),
            pl.BlockSpec((1, D), lambda i, f: (0, 0)),
            pl.BlockSpec((1, D), lambda i, f: (0, 0)),
            pl.BlockSpec((1, D), lambda i, f: (0, 0)),
        ],
        out_specs=pl.BlockSpec((tm, D), lambda i, f: (i, 0)),
        scratch_shapes=[pltpu.VMEM((tm, D), jnp.float32)],
        compiler_params=_cparams("parallel", "arbitrary"),
    )(x, w1, b1, w2, b2, gamma, beta)


def layernorm(x, gamma, beta, eps=1e-5, out_dtype=jnp.float32, tm=1024):
    M, D = x.shape
    tm = _fit(M, tm, 8)
    return pl.pallas_call(
        functools.partial(_ln_kernel, eps=eps),
        out_shape=jax.ShapeDtypeStruct((M, D), out_dtype),
        grid=(M // tm,),
        in_specs=[
            pl.BlockSpec((tm, D), lambda i: (i, 0)),
            pl.BlockSpec((1, D), lambda i: (0, 0)),
            pl.BlockSpec((1, D), lambda i: (0, 0)),
        ],
        out_specs=pl.BlockSpec((tm, D), lambda i: (i, 0)),
        compiler_params=_cparams("parallel"),
    )(x, gamma, beta)


def attention(q, kv, mask, nhead, out_dtype=jnp.bfloat16, tq=256):
    """q: (B, L, D), kv: (B, S, 2D) fused K|V, mask: (L, S) additive -> (B, L, D)."""
    B, L, D = q.shape
    S = kv.shape[1]
    dh = D // nhead
    scale = 1.0 / math.sqrt(dh)
    tq = _fit(L, tq, 8)
    return pl.pallas_call(
        functools.partial(_attn_kernel, nhead=nhead, scale=scale),
        out_shape=jax.ShapeDtypeStruct((B, L, D), out_dtype),
        grid=(B, L // tq),
        in_specs=[
            pl.BlockSpec((1, tq, D), lambda b, i: (b, i, 0)),
            pl.BlockSpec((1, S, 2 * D), lambda b, i: (b, 0, 0)),  # resident per batch
            pl.BlockSpec((tq, S), lambda b, i: (i, 0)),
        ],
        out_specs=pl.BlockSpec((1, tq, D), lambda b, i: (b, i, 0)),
        compiler_params=_cparams("parallel", "parallel"),
    )(q, kv, mask)


# --------------------------- Decoder forward --------------------------------

def decoder_layer_forward(x2d, mem2d, p, nhead, B, L, S, D, tgt_mask, mem_mask):
    # --- self attention: q proj + fused K|V proj ---
    q = matmul(x2d, p["wq"], p["bq"]).reshape(B, L, D)
    kv = matmul(x2d, p["wkv"], p["bkv"]).reshape(B, L, 2 * D)
    a = attention(q, kv, tgt_mask, nhead).reshape(B * L, D)
    x2d = matmul_add_ln(a, p["wo"], p["bo"], x2d, p["g1"], p["be1"])

    # --- cross attention: q from x, fused K|V from memory ---
    q = matmul(x2d, p["cwq"], p["cbq"]).reshape(B, L, D)
    kv = matmul(mem2d, p["cwkv"], p["cbkv"]).reshape(B, S, 2 * D)
    a = attention(q, kv, mem_mask, nhead).reshape(B * L, D)
    x2d = matmul_add_ln(a, p["cwo"], p["cbo"], x2d, p["g2"], p["be2"])

    # --- feed forward (+ residual + LayerNorm fused) ---
    x2d = ffn_add_ln(x2d, p["w1"], p["b1"], p["w2"], p["b2"],
                     p["g3"], p["be3"])
    return x2d


def transformer_decoder_forward(tgt, memory, params, nhead, tgt_mask, memory_mask):
    """Mirrors TransformerDecoder.forward with use_cache=False."""
    B, L, D = tgt.shape
    S = memory.shape[1]
    # PyTorch code: memory_mask[:, -tgt.size(1):] applied as mask rows over tgt
    memory_mask_sliced = memory_mask[-L:, :] * 0.0 + memory_mask[-L:, :]  # keep shape (L, S)
    memory_mask_sliced = memory_mask[-L:, :] if memory_mask.shape[0] >= L else memory_mask
    # NOTE: PyTorch slices dim 1 of an (L, S) mask relative to tgt len; with
    # equal target lengths this is the identity.  Replicate the exact slice:
    memory_mask_sliced = memory_mask[:, -L:] if memory_mask.shape[1] >= L else memory_mask
    x2d = tgt.astype(jnp.bfloat16).reshape(B * L, D)
    mem2d = memory.astype(jnp.bfloat16).reshape(B * S, D)
    new_caches = []
    for p in params["layers"]:
        x2d = decoder_layer_forward(x2d, mem2d, p, nhead, B, L, S, D,
                                    tgt_mask, memory_mask_sliced)
        new_caches.append(None)
    out2d = layernorm(x2d, params["g_final"], params["b_final"],
                      out_dtype=jnp.float32)
    return out2d.reshape(B, L, D), new_caches


# ----------------------------- Param init -----------------------------------

def init_params(key, d_model, nhead, num_layers, dim_ff):
    def lin(k, fan_in, fan_out):
        kw, kb = jax.random.split(k)
        w = (jax.random.normal(kw, (fan_in, fan_out), jnp.float32) * 0.02
             ).astype(jnp.bfloat16)
        b = jax.random.normal(kb, (1, fan_out), jnp.float32) * 0.02
        return w, b

    layers = []
    for _ in range(num_layers):
        keys = jax.random.split(key, 9)
        key = keys[0]
        p = {}
        p["wq"], p["bq"] = lin(keys[1], d_model, d_model)
        p["wkv"], p["bkv"] = lin(keys[2], d_model, 2 * d_model)      # wk|wv fused
        p["wo"], p["bo"] = lin(keys[3], d_model, d_model)
        p["cwq"], p["cbq"] = lin(keys[4], d_model, d_model)
        p["cwkv"], p["cbkv"] = lin(keys[5], d_model, 2 * d_model)    # cwk|cwv fused
        p["cwo"], p["cbo"] = lin(keys[6], d_model, d_model)
        p["w1"], p["b1"] = lin(keys[7], d_model, dim_ff)
        p["w2"], p["b2"] = lin(keys[8], dim_ff, d_model)
        for n in ("1", "2", "3"):
            p["g" + n] = jnp.ones((1, d_model), jnp.float32)
            p["be" + n] = jnp.zeros((1, d_model), jnp.float32)
        layers.append(p)

    return {
        "layers": layers,
        "g_final": jnp.ones((1, d_model), jnp.float32),
        "b_final": jnp.zeros((1, d_model), jnp.float32),
    }


# --------------------------------- Main --------------------------------------

if __name__ == "__main__":
    B, L, S = 2, 8, 8          # target length == memory length (so the
                               # memory_mask[:, -L:] slice is well-formed)
    D, NHEAD, NLAYERS, DFF = 32, 4, 2, 64

    key = jax.random.PRNGKey(0)
    k_tgt, k_mem, k_par = jax.random.split(key, 3)

    tgt = jax.random.normal(k_tgt, (B, L, D), jnp.float32)
    memory = jax.random.normal(k_mem, (B, S, D), jnp.float32)

    # causal additive mask (L, L)
    tgt_mask = jnp.where(
        jnp.arange(L)[:, None] >= jnp.arange(L)[None, :], 0.0, -1e9
    ).astype(jnp.float32)
    # memory mask: (L, S) additive, all visible
    memory_mask = jnp.zeros((L, S), jnp.float32)

    params = init_params(k_par, D, NHEAD, NLAYERS, DFF)

    fwd = jax.jit(transformer_decoder_forward, static_argnames=("nhead",))
    out, caches = fwd(tgt, memory, params, nhead=NHEAD,
                      tgt_mask=tgt_mask, memory_mask=memory_mask)
    out = jax.block_until_ready(out)

    assert out.shape == (B, L, D)
    assert len(caches) == NLAYERS
    assert bool(jnp.all(jnp.isfinite(out)))
    print("KERNEL_OK")
</pallas_src>

<mosaic_0001>
module attributes {stable_mosaic.version = 11 : i64} {
  func.func @_matmul_kernel(%arg0: i32, %arg1: i32, %arg2: i32, %arg3: memref<16x32xbf16, #tpu.memory_space<vmem>>, %arg4: memref<32x32xbf16, #tpu.memory_space<vmem>>, %arg5: memref<1x32xf32, #tpu.memory_space<vmem>>, %arg6: memref<16x32xbf16, #tpu.memory_space<vmem>>, %arg7: memref<16x32xf32, #tpu.memory_space<vmem>>) attributes {dimension_semantics = [#tpu.dimension_semantics<parallel>, #tpu.dimension_semantics<parallel>, #tpu.dimension_semantics<arbitrary>], iteration_bounds = array<i64: 1, 1, 1>, scalar_prefetch = 0 : i64, scratch_operands = 1 : i64, tpu.core_type = #tpu.core_type<tc>, window_params = [{transform_indices = @transform_0, window_bounds = array<i64: 16, 32>}, {transform_indices = @transform_1, window_bounds = array<i64: 32, 32>}, {transform_indices = @transform_2, window_bounds = array<i64: 1, 32>}, {transform_indices = @transform_3, window_bounds = array<i64: 16, 32>}]} {
    %c0_i32 = arith.constant 0 : i32
    %0 = arith.cmpi eq, %arg2, %c0_i32 : i32
    %1 = arith.extui %0 : i1 to i32
    %c0_i32_0 = arith.constant 0 : i32
    %2 = arith.cmpi ne, %1, %c0_i32_0 : i32
    scf.if %2 {
      %cst_10 = arith.constant 0.000000e+00 : f32
      %12 = vector.broadcast %cst_10 : f32 to vector<16x32xf32>
      %c0_11 = arith.constant 0 : index
      %c0_12 = arith.constant 0 : index
      %13 = vector.load %arg7[%c0_11, %c0_12] : memref<16x32xf32, #tpu.memory_space<vmem>>, vector<16x32xf32>
      tpu.vector_store %arg7[%c0_11, %c0_12], %12 {strides = array<i32>} : memref<16x32xf32, #tpu.memory_space<vmem>>, vector<16x32xf32>,
    } else {
    }
    %c0 = arith.constant 0 : index
    %c0_1 = arith.constant 0 : index
    %3 = vector.load %arg7[%c0, %c0_1] : memref<16x32xf32, #tpu.memory_space<vmem>>, vector<16x32xf32>
    %c0_2 = arith.constant 0 : index
    %c0_3 = arith.constant 0 : index
    %4 = vector.load %arg3[%c0_2, %c0_3] : memref<16x32xbf16, #tpu.memory_space<vmem>>, vector<16x32xbf16>
    %c0_4 = arith.constant 0 : index
    %c0_5 = arith.constant 0 : index
    %5 = vector.load %arg4[%c0_4, %c0_5] : memref<32x32xbf16, #tpu.memory_space<vmem>>, vector<32x32xbf16>
    %cst = arith.constant dense<0.000000e+00> : vector<16x32xf32>
    %6 = tpu.matmul %4, %5, %cst {dimension_numbers = #tpu.dot_dimension_numbers<[1], [0], [0], [1], [0, 0, 1, 1], [], []>} : vector<16x32xbf16>, vector<32x32xbf16>, vector<16x32xf32> -> vector<16x32xf32>
    %7 = arith.addf %3, %6 : vector<16x32xf32>
    %c0_6 = arith.constant 0 : index
    %c0_7 = arith.constant 0 : index
    %8 = vector.load %arg7[%c0_6, %c0_7] : memref<16x32xf32, #tpu.memory_space<vmem>>, vector<16x32xf32>
    tpu.vector_store %arg7[%c0_6, %c0_7], %7 {strides = array<i32>} : memref<16x32xf32, #tpu.memory_space<vmem>>, vector<16x32xf32>,
    %c0_i32_8 = arith.constant 0 : i32
    %9 = arith.cmpi eq, %arg2, %c0_i32_8 : i32
    %10 = arith.extui %9 : i1 to i32
    %c0_i32_9 = arith.constant 0 : i32
    %11 = arith.cmpi ne, %10, %c0_i32_9 : i32
    scf.if %11 {
      %c0_10 = arith.constant 0 : index
      %c0_11 = arith.constant 0 : index
      %12 = vector.load %arg7[%c0_10, %c0_11] : memref<16x32xf32, #tpu.memory_space<vmem>>, vector<16x32xf32>
      %c0_12 = arith.constant 0 : index
      %c0_13 = arith.constant 0 : index
      %13 = vector.load %arg5[%c0_12, %c0_13] : memref<1x32xf32, #tpu.memory_space<vmem>>, vector<1x32xf32>
      %14 = vector.broadcast %13 : vector<1x32xf32> to vector<16x32xf32>
      %15 = arith.addf %12, %14 : vector<16x32xf32>
      %16 = arith.truncf %15 : vector<16x32xf32> to vector<16x32xbf16>
      %c0_14 = arith.constant 0 : index
      %c0_15 = arith.constant 0 : index
      %17 = vector.load %arg6[%c0_14, %c0_15] : memref<16x32xbf16, #tpu.memory_space<vmem>>, vector<16x32xbf16>
      tpu.vector_store %arg6[%c0_14, %c0_15], %16 {strides = array<i32>} : memref<16x32xbf16, #tpu.memory_space<vmem>>, vector<16x32xbf16>,
    } else {
    }
    return
  }
  func.func @transform_0(%arg0: i32, %arg1: i32, %arg2: i32) -> (i32, i32) {
    %c0_i32 = arith.constant 0 : i32
    return %arg0, %arg2 : i32, i32
  }
  func.func @transform_1(%arg0: i32, %arg1: i32, %arg2: i32) -> (i32, i32) {
    %c0_i32 = arith.constant 0 : i32
    return %arg2, %arg1 : i32, i32
  }
  func.func @transform_2(%arg0: i32, %arg1: i32, %arg2: i32) -> (i32, i32) {
    %c0_i32 = arith.constant 0 : i32
    %c0_i32_0 = arith.constant 0 : i32
    return %c0_i32, %arg1 : i32, i32
  }
  func.func @transform_3(%arg0: i32, %arg1: i32, %arg2: i32) -> (i32, i32) {
    %c0_i32 = arith.constant 0 : i32
    return %arg0, %arg1 : i32, i32
  }
}

module attributes {stable_mosaic.version = 11 : i64} {
  func.func @_matmul_kernel(%arg0: i32, %arg1: i32, %arg2: i32, %arg3: memref<16x32xbf16, #tpu.memory_space<vmem>>, %arg4: memref<32x64xbf16, #tpu.memory_space<vmem>>, %arg5: memref<1x64xf32, #tpu.memory_space<vmem>>, %arg6: memref<16x64xbf16, #tpu.memory_space<vmem>>, %arg7: memref<16x64xf32, #tpu.memory_space<vmem>>) attributes {dimension_semantics = [#tpu.dimension_semantics<parallel>, #tpu.dimension_semantics<parallel>, #tpu.dimension_semantics<arbitrary>], iteration_bounds = array<i64: 1, 1, 1>, scalar_prefetch = 0 : i64, scratch_operands = 1 : i64, tpu.core_type = #tpu.core_type<tc>, window_params = [{transform_indices = @transform_0, window_bounds = array<i64: 16, 32>}, {transform_indices = @transform_1, window_bounds = array<i64: 32, 64>}, {transform_indices = @transform_2, window_bounds = array<i64: 1, 64>}, {transform_indices = @transform_3, window_bounds = array<i64: 16, 64>}]} {
    %c0_i32 = arith.constant 0 : i32
    %0 = arith.cmpi eq, %arg2, %c0_i32 : i32
    %1 = arith.extui %0 : i1 to i32
    %c0_i32_0 = arith.constant 0 : i32
    %2 = arith.cmpi ne, %1, %c0_i32_0 : i32
    scf.if %2 {
      %cst_10 = arith.constant 0.000000e+00 : f32
      %12 = vector.broadcast %cst_10 : f32 to vector<16x64xf32>
      %c0_11 = arith.constant 0 : index
      %c0_12 = arith.constant 0 : index
      %13 = vector.load %arg7[%c0_11, %c0_12] : memref<16x64xf32, #tpu.memory_space<vmem>>, vector<16x64xf32>
      tpu.vector_store %arg7[%c0_11, %c0_12], %12 {strides = array<i32>} : memref<16x64xf32, #tpu.memory_space<vmem>>, vector<16x64xf32>,
    } else {
    }
    %c0 = arith.constant 0 : index
    %c0_1 = arith.constant 0 : index
    %3 = vector.load %arg7[%c0, %c0_1] : memref<16x64xf32, #tpu.memory_space<vmem>>, vector<16x64xf32>
    %c0_2 = arith.constant 0 : index
    %c0_3 = arith.constant 0 : index
    %4 = vector.load %arg3[%c0_2, %c0_3] : memref<16x32xbf16, #tpu.memory_space<vmem>>, vector<16x32xbf16>
    %c0_4 = arith.constant 0 : index
    %c0_5 = arith.constant 0 : index
    %5 = vector.load %arg4[%c0_4, %c0_5] : memref<32x64xbf16, #tpu.memory_space<vmem>>, vector<32x64xbf16>
    %cst = arith.constant dense<0.000000e+00> : vector<16x64xf32>
    %6 = tpu.matmul %4, %5, %cst {dimension_numbers = #tpu.dot_dimension_numbers<[1], [0], [0], [1], [0, 0, 1, 1], [], []>} : vector<16x32xbf16>, vector<32x64xbf16>, vector<16x64xf32> -> vector<16x64xf32>
    %7 = arith.addf %3, %6 : vector<16x64xf32>
    %c0_6 = arith.constant 0 : index
    %c0_7 = arith.constant 0 : index
    %8 = vector.load %arg7[%c0_6, %c0_7] : memref<16x64xf32, #tpu.memory_space<vmem>>, vector<16x64xf32>
    tpu.vector_store %arg7[%c0_6, %c0_7], %7 {strides = array<i32>} : memref<16x64xf32, #tpu.memory_space<vmem>>, vector<16x64xf32>,
    %c0_i32_8 = arith.constant 0 : i32
    %9 = arith.cmpi eq, %arg2, %c0_i32_8 : i32
    %10 = arith.extui %9 : i1 to i32
    %c0_i32_9 = arith.constant 0 : i32
    %11 = arith.cmpi ne, %10, %c0_i32_9 : i32
    scf.if %11 {
      %c0_10 = arith.constant 0 : index
      %c0_11 = arith.constant 0 : index
      %12 = vector.load %arg7[%c0_10, %c0_11] : memref<16x64xf32, #tpu.memory_space<vmem>>, vector<16x64xf32>
      %c0_12 = arith.constant 0 : index
      %c0_13 = arith.constant 0 : index
      %13 = vector.load %arg5[%c0_12, %c0_13] : memref<1x64xf32, #tpu.memory_space<vmem>>, vector<1x64xf32>
      %14 = vector.broadcast %13 : vector<1x64xf32> to vector<16x64xf32>
      %15 = arith.addf %12, %14 : vector<16x64xf32>
      %16 = arith.truncf %15 : vector<16x64xf32> to vector<16x64xbf16>
      %c0_14 = arith.constant 0 : index
      %c0_15 = arith.constant 0 : index
      %17 = vector.load %arg6[%c0_14, %c0_15] : memref<16x64xbf16, #tpu.memory_space<vmem>>, vector<16x64xbf16>
      tpu.vector_store %arg6[%c0_14, %c0_15], %16 {strides = array<i32>} : memref<16x64xbf16, #tpu.memory_space<vmem>>, vector<16x64xbf16>,
    } else {
    }
    return
  }
  func.func @transform_0(%arg0: i32, %arg1: i32, %arg2: i32) -> (i32, i32) {
    %c0_i32 = arith.constant 0 : i32
    return %arg0, %arg2 : i32, i32
  }
  func.func @transform_1(%arg0: i32, %arg1: i32, %arg2: i32) -> (i32, i32) {
    %c0_i32 = arith.constant 0 : i32
    return %arg2, %arg1 : i32, i32
  }
  func.func @transform_2(%arg0: i32, %arg1: i32, %arg2: i32) -> (i32, i32) {
    %c0_i32 = arith.constant 0 : i32
    %c0_i32_0 = arith.constant 0 : i32
    return %c0_i32, %arg1 : i32, i32
  }
  func.func @transform_3(%arg0: i32, %arg1: i32, %arg2: i32) -> (i32, i32) {
    %c0_i32 = arith.constant 0 : i32
    return %arg0, %arg1 : i32, i32
  }
}

module attributes {stable_mosaic.version = 11 : i64} {
  func.func @_matmul_add_ln_kernel(%arg0: i32, %arg1: i32, %arg2: memref<16x32xbf16, #tpu.memory_space<vmem>>, %arg3: memref<32x32xbf16, #tpu.memory_space<vmem>>, %arg4: memref<1x32xf32, #tpu.memory_space<vmem>>, %arg5: memref<16x32xbf16, #tpu.memory_space<vmem>>, %arg6: memref<1x32xf32, #tpu.memory_space<vmem>>, %arg7: memref<1x32xf32, #tpu.memory_space<vmem>>, %arg8: memref<16x32xbf16, #tpu.memory_space<vmem>>, %arg9: memref<16x32xf32, #tpu.memory_space<vmem>>) attributes {dimension_semantics = [#tpu.dimension_semantics<parallel>, #tpu.dimension_semantics<arbitrary>], iteration_bounds = array<i64: 1, 1>, scalar_prefetch = 0 : i64, scratch_operands = 1 : i64, tpu.core_type = #tpu.core_type<tc>, window_params = [{transform_indices = @transform_0, window_bounds = array<i64: 16, 32>}, {transform_indices = @transform_1, window_bounds = array<i64: 32, 32>}, {pipeline_mode = #tpu.pipeline_mode<synchronous>, transform_indices = @transform_2, window_bounds = array<i64: 1, 32>}, {transform_indices = @transform_3, window_bounds = array<i64: 16, 32>}, {pipeline_mode = #tpu.pipeline_mode<synchronous>, transform_indices = @transform_4, window_bounds = array<i64: 1, 32>}, {pipeline_mode = #tpu.pipeline_mode<synchronous>, transform_indices = @transform_5, window_bounds = array<i64: 1, 32>}, {transform_indices = @transform_6, window_bounds = array<i64: 16, 32>}]} {
    %c0_i32 = arith.constant 0 : i32
    %0 = arith.cmpi eq, %arg1, %c0_i32 : i32
    %1 = arith.extui %0 : i1 to i32
    %c0_i32_0 = arith.constant 0 : i32
    %2 = arith.cmpi ne, %1, %c0_i32_0 : i32
    scf.if %2 {
      %cst_10 = arith.constant 0.000000e+00 : f32
      %12 = vector.broadcast %cst_10 : f32 to vector<16x32xf32>
      %c0_11 = arith.constant 0 : index
      %c0_12 = arith.constant 0 : index
      %13 = vector.load %arg9[%c0_11, %c0_12] : memref<16x32xf32, #tpu.memory_space<vmem>>, vector<16x32xf32>
      tpu.vector_store %arg9[%c0_11, %c0_12], %12 {strides = array<i32>} : memref<16x32xf32, #tpu.memory_space<vmem>>, vector<16x32xf32>,
    } else {
    }
    %c0 = arith.constant 0 : index
    %c0_1 = arith.constant 0 : index
    %3 = vector.load %arg9[%c0, %c0_1] : memref<16x32xf32, #tpu.memory_space<vmem>>, vector<16x32xf32>
    %c0_2 = arith.constant 0 : index
    %c0_3 = arith.constant 0 : index
    %4 = vector.load %arg2[%c0_2, %c0_3] : memref<16x32xbf16, #tpu.memory_space<vmem>>, vector<16x32xbf16>
    %c0_4 = arith.constant 0 : index
    %c0_5 = arith.constant 0 : index
    %5 = vector.load %arg3[%c0_4, %c0_5] : memref<32x32xbf16, #tpu.memory_space<vmem>>, vector<32x32xbf16>
    %cst = arith.constant dense<0.000000e+00> : vector<16x32xf32>
    %6 = tpu.matmul %4, %5, %cst {dimension_numbers = #tpu.dot_dimension_numbers<[1], [0], [0], [1], [0, 0, 1, 1], [], []>} : vector<16x32xbf16>, vector<32x32xbf16>, vector<16x32xf32> -> vector<16x32xf32>
    %7 = arith.addf %3, %6 : vector<16x32xf32>
    %c0_6 = arith.constant 0 : index
    %c0_7 = arith.constant 0 : index
    %8 = vector.load %arg9[%c0_6, %c0_7] : memref<16x32xf32, #tpu.memory_space<vmem>>, vector<16x32xf32>
    tpu.vector_store %arg9[%c0_6, %c0_7], %7 {strides = array<i32>} : memref<16x32xf32, #tpu.memory_space<vmem>>, vector<16x32xf32>,
    %c0_i32_8 = arith.constant 0 : i32
    %9 = arith.cmpi eq, %arg1, %c0_i32_8 : i32
    %10 = arith.extui %9 : i1 to i32
    %c0_i32_9 = arith.constant 0 : i32
    %11 = arith.cmpi ne, %10, %c0_i32_9 : i32
    scf.if %11 {
      %c0_10 = arith.constant 0 : index
      %c0_11 = arith.constant 0 : index
      %12 = vector.load %arg9[%c0_10, %c0_11] : memref<16x32xf32, #tpu.memory_space<vmem>>, vector<16x32xf32>
      %c0_12 = arith.constant 0 : index
      %c0_13 = arith.constant 0 : index
      %13 = vector.load %arg4[%c0_12, %c0_13] : memref<1x32xf32, #tpu.memory_space<vmem>>, vector<1x32xf32>
      %14 = vector.broadcast %13 : vector<1x32xf32> to vector<16x32xf32>
      %15 = arith.addf %12, %14 : vector<16x32xf32>
      %c0_14 = arith.constant 0 : index
      %c0_15 = arith.constant 0 : index
      %16 = vector.load %arg5[%c0_14, %c0_15] : memref<16x32xbf16, #tpu.memory_space<vmem>>, vector<16x32xbf16>
      %17 = arith.extf %16 : vector<16x32xbf16> to vector<16x32xf32>
      %18 = arith.addf %15, %17 : vector<16x32xf32>
      %cst_16 = arith.constant dense<0.000000e+00> : vector<16xf32>
      %19 = vector.multi_reduction <add>, %18, %cst_16 [1] : vector<16x32xf32> to vector<16xf32>
      %20 = vector.shape_cast %19 : vector<16xf32> to vector<16x1xf32>
      %cst_17 = arith.constant 3.200000e+01 : f32
      %21 = vector.broadcast %cst_17 : f32 to vector<16x1xf32>
      %22 = arith.divf %20, %21 : vector<16x1xf32>
      %23 = vector.broadcast %22 : vector<16x1xf32> to vector<16x32xf32>
      %24 = arith.subf %18, %23 : vector<16x32xf32>
      %25 = arith.mulf %24, %24 : vector<16x32xf32>
      %cst_18 = arith.constant dense<0.000000e+00> : vector<16xf32>
      %26 = vector.multi_reduction <add>, %25, %cst_18 [1] : vector<16x32xf32> to vector<16xf32>
      %27 = vector.shape_cast %26 : vector<16xf32> to vector<16x1xf32>
      %cst_19 = arith.constant 3.200000e+01 : f32
      %28 = vector.broadcast %cst_19 : f32 to vector<16x1xf32>
      %29 = arith.divf %27, %28 : vector<16x1xf32>
      %30 = vector.broadcast %22 : vector<16x1xf32> to vector<16x32xf32>
      %31 = arith.subf %18, %30 : vector<16x32xf32>
      %cst_20 = arith.constant 9.99999974E-6 : f32
      %32 = vector.broadcast %cst_20 : f32 to vector<16x1xf32>
      %33 = arith.addf %29, %32 : vector<16x1xf32>
      %34 = math.rsqrt %33 : vector<16x1xf32>
      %35 = vector.broadcast %34 : vector<16x1xf32> to vector<16x32xf32>
      %36 = arith.mulf %31, %35 : vector<16x32xf32>
      %c0_21 = arith.constant 0 : index
      %c0_22 = arith.constant 0 : index
      %37 = vector.load %arg6[%c0_21, %c0_22] : memref<1x32xf32, #tpu.memory_space<vmem>>, vector<1x32xf32>
      %38 = vector.broadcast %37 : vector<1x32xf32> to vector<16x32xf32>
      %39 = arith.mulf %36, %38 : vector<16x32xf32>
      %c0_23 = arith.constant 0 : index
      %c0_24 = arith.constant 0 : index
      %40 = vector.load %arg7[%c0_23, %c0_24] : memref<1x32xf32, #tpu.memory_space<vmem>>, vector<1x32xf32>
      %41 = vector.broadcast %40 : vector<1x32xf32> to vector<16x32xf32>
      %42 = arith.addf %39, %41 : vector<16x32xf32>
      %43 = arith.truncf %42 : vector<16x32xf32> to vector<16x32xbf16>
      %c0_25 = arith.constant 0 : index
      %c0_26 = arith.constant 0 : index
      %44 = vector.load %arg8[%c0_25, %c0_26] : memref<16x32xbf16, #tpu.memory_space<vmem>>, vector<16x32xbf16>
      tpu.vector_store %arg8[%c0_25, %c0_26], %43 {strides = array<i32>} : memref<16x32xbf16, #tpu.memory_space<vmem>>, vector<16x32xbf16>,
    } else {
    }
    return
  }
  func.func @transform_0(%arg0: i32, %arg1: i32) -> (i32, i32) {
    %c0_i32 = arith.constant 0 : i32
    return %arg0, %arg1 : i32, i32
  }
  func.func @transform_1(%arg0: i32, %arg1: i32) -> (i32, i32) {
    %c0_i32 = arith.constant 0 : i32
    %c0_i32_0 = arith.constant 0 : i32
    return %arg1, %c0_i32 : i32, i32
  }
  func.func @transform_2(%arg0: i32, %arg1: i32) -> (i32, i32) {
    %c0_i32 = arith.constant 0 : i32
    %c0_i32_0 = arith.constant 0 : i32
    %c0_i32_1 = arith.constant 0 : i32
    return %c0_i32, %c0_i32_0 : i32, i32
  }
  func.func @transform_3(%arg0: i32, %arg1: i32) -> (i32, i32) {
    %c0_i32 = arith.constant 0 : i32
    %c0_i32_0 = arith.constant 0 : i32
    return %arg0, %c0_i32 : i32, i32
  }
  func.func @transform_4(%arg0: i32, %arg1: i32) -> (i32, i32) {
    %c0_i32 = arith.constant 0 : i32
    %c0_i32_0 = arith.constant 0 : i32
    %c0_i32_1 = arith.constant 0 : i32
    return %c0_i32, %c0_i32_0 : i32, i32
  }
  func.func @transform_5(%arg0: i32, %arg1: i32) -> (i32, i32) {
    %c0_i32 = arith.constant 0 : i32
    %c0_i32_0 = arith.constant 0 : i32
    %c0_i32_1 = arith.constant 0 : i32
    return %c0_i32, %c0_i32_0 : i32, i32
  }
  func.func @transform_6(%arg0: i32, %arg1: i32) -> (i32, i32) {
    %c0_i32 = arith.constant 0 : i32
    %c0_i32_0 = arith.constant 0 : i32
    return %arg0, %c0_i32 : i32, i32
  }
}

module attributes {stable_mosaic.version = 11 : i64} {
  func.func @_attn_kernel(%arg0: i32, %arg1: i32, %arg2: memref<1x8x32xbf16, #tpu.memory_space<vmem>>, %arg3: memref<1x8x64xbf16, #tpu.memory_space<vmem>>, %arg4: memref<8x8xf32, #tpu.memory_space<vmem>>, %arg5: memref<1x8x32xbf16, #tpu.memory_space<vmem>>) attributes {dimension_semantics = [#tpu.dimension_semantics<parallel>, #tpu.dimension_semantics<parallel>], iteration_bounds = array<i64: 2, 1>, scalar_prefetch = 0 : i64, scratch_operands = 0 : i64, tpu.core_type = #tpu.core_type<tc>, window_params = [{transform_indices = @transform_0, window_bounds = array<i64: 1, 8, 32>}, {transform_indices = @transform_1, window_bounds = array<i64: 1, 8, 64>}, {transform_indices = @transform_2, window_bounds = array<i64: 8, 8>}, {transform_indices = @transform_3, window_bounds = array<i64: 1, 8, 32>}]} {
    %c0 = arith.constant 0 : index
    %c0_0 = arith.constant 0 : index
    %0 = vector.load %arg4[%c0, %c0_0] : memref<8x8xf32, #tpu.memory_space<vmem>>, vector<8x8xf32>
    %c0_1 = arith.constant 0 : index
    %c0_2 = arith.constant 0 : index
    %c0_3 = arith.constant 0 : index
    %1 = vector.load %arg2[%c0_1, %c0_2, %c0_3] : memref<1x8x32xbf16, #tpu.memory_space<vmem>>, vector<1x8x8xbf16>
    %2 = vector.shape_cast %1 : vector<1x8x8xbf16> to vector<8x8xbf16>
    %cst = arith.constant 3.535160e-01 : bf16
    %3 = vector.broadcast %cst : bf16 to vector<8x8xbf16>
    %4 = arith.mulf %2, %3 : vector<8x8xbf16>
    %c0_4 = arith.constant 0 : index
    %c0_5 = arith.constant 0 : index
    %c0_6 = arith.constant 0 : index
    %5 = vector.load %arg3[%c0_4, %c0_5, %c0_6] : memref<1x8x64xbf16, #tpu.memory_space<vmem>>, vector<1x8x8xbf16>
    %6 = vector.shape_cast %5 : vector<1x8x8xbf16> to vector<8x8xbf16>
    %c0_7 = arith.constant 0 : index
    %c0_8 = arith.constant 0 : index
    %c32 = arith.constant 32 : index
    %7 = vector.load %arg3[%c0_7, %c0_8, %c32] : memref<1x8x64xbf16, #tpu.memory_space<vmem>>, vector<1x8x8xbf16>
    %8 = vector.shape_cast %7 : vector<1x8x8xbf16> to vector<8x8xbf16>
    %cst_9 = arith.constant dense<0.000000e+00> : vector<8x8xf32>
    %9 = tpu.matmul %4, %6, %cst_9 {dimension_numbers = #tpu.dot_dimension_numbers<[1], [1], [0], [0], [0, 0, 1, 0], [], []>} : vector<8x8xbf16>, vector<8x8xbf16>, vector<8x8xf32> -> vector<8x8xf32>
    %10 = arith.addf %9, %0 : vector<8x8xf32>
    %cst_10 = arith.constant dense<0xFF800000> : vector<8xf32>
    %11 = vector.multi_reduction <maximumf>, %10, %cst_10 [1] : vector<8x8xf32> to vector<8xf32>
    %12 = vector.shape_cast %11 : vector<8xf32> to vector<8x1xf32>
    %13 = vector.broadcast %12 : vector<8x1xf32> to vector<8x8xf32>
    %14 = arith.subf %10, %13 : vector<8x8xf32>
    %15 = math.exp %14 : vector<8x8xf32>
    %cst_11 = arith.constant dense<0.000000e+00> : vector<8xf32>
    %16 = vector.multi_reduction <add>, %15, %cst_11 [1] : vector<8x8xf32> to vector<8xf32>
    %17 = vector.shape_cast %16 : vector<8xf32> to vector<8x1xf32>
    %18 = tpu.reciprocal %17 {approx = true} : vector<8x1xf32> -> vector<8x1xf32>
    %19 = vector.broadcast %18 : vector<8x1xf32> to vector<8x8xf32>
    %20 = arith.mulf %15, %19 : vector<8x8xf32>
    %21 = arith.truncf %20 : vector<8x8xf32> to vector<8x8xbf16>
    %cst_12 = arith.constant dense<0.000000e+00> : vector<8x8xf32>
    %22 = tpu.matmul %21, %8, %cst_12 {dimension_numbers = #tpu.dot_dimension_numbers<[1], [0], [0], [1], [0, 0, 1, 1], [], []>} : vector<8x8xbf16>, vector<8x8xbf16>, vector<8x8xf32> -> vector<8x8xf32>
    %c0_13 = arith.constant 0 : index
    %c0_14 = arith.constant 0 : index
    %c8 = arith.constant 8 : index
    %23 = vector.load %arg2[%c0_13, %c0_14, %c8] : memref<1x8x32xbf16, #tpu.memory_space<vmem>>, vector<1x8x8xbf16>
    %24 = vector.shape_cast %23 : vector<1x8x8xbf16> to vector<8x8xbf16>
    %cst_15 = arith.constant 3.535160e-01 : bf16
    %25 = vector.broadcast %cst_15 : bf16 to vector<8x8xbf16>
    %26 = arith.mulf %24, %25 : vector<8x8xbf16>
    %c0_16 = arith.constant 0 : index
    %c0_17 = arith.constant 0 : index
    %c8_18 = arith.constant 8 : index
    %27 = vector.load %arg3[%c0_16, %c0_17, %c8_18] : memref<1x8x64xbf16, #tpu.memory_space<vmem>>, vector<1x8x8xbf16>
    %28 = vector.shape_cast %27 : vector<1x8x8xbf16> to vector<8x8xbf16>
    %c0_19 = arith.constant 0 : index
    %c0_20 = arith.constant 0 : index
    %c40 = arith.constant 40 : index
    %29 = vector.load %arg3[%c0_19, %c0_20, %c40] : memref<1x8x64xbf16, #tpu.memory_space<vmem>>, vector<1x8x8xbf16>
    %30 = vector.shape_cast %29 : vector<1x8x8xbf16> to vector<8x8xbf16>
    %cst_21 = arith.constant dense<0.000000e+00> : vector<8x8xf32>
    %31 = tpu.matmul %26, %28, %cst_21 {dimension_numbers = #tpu.dot_dimension_numbers<[1], [1], [0], [0], [0, 0, 1, 0], [], []>} : vector<8x8xbf16>, vector<8x8xbf16>, vector<8x8xf32> -> vector<8x8xf32>
    %32 = arith.addf %31, %0 : vector<8x8xf32>
    %cst_22 = arith.constant dense<0xFF800000> : vector<8xf32>
    %33 = vector.multi_reduction <maximumf>, %32, %cst_22 [1] : vector<8x8xf32> to vector<8xf32>
    %34 = vector.shape_cast %33 : vector<8xf32> to vector<8x1xf32>
    %35 = vector.broadcast %34 : vector<8x1xf32> to vector<8x8xf32>
    %36 = arith.subf %32, %35 : vector<8x8xf32>
    %37 = math.exp %36 : vector<8x8xf32>
    %cst_23 = arith.constant dense<0.000000e+00> : vector<8xf32>
    %38 = vector.multi_reduction <add>, %37, %cst_23 [1] : vector<8x8xf32> to vector<8xf32>
    %39 = vector.shape_cast %38 : vector<8xf32> to vector<8x1xf32>
    %40 = tpu.reciprocal %39 {approx = true} : vector<8x1xf32> -> vector<8x1xf32>
    %41 = vector.broadcast %40 : vector<8x1xf32> to vector<8x8xf32>
    %42 = arith.mulf %37, %41 : vector<8x8xf32>
    %43 = arith.truncf %42 : vector<8x8xf32> to vector<8x8xbf16>
    %cst_24 = arith.constant dense<0.000000e+00> : vector<8x8xf32>
    %44 = tpu.matmul %43, %30, %cst_24 {dimension_numbers = #tpu.dot_dimension_numbers<[1], [0], [0], [1], [0, 0, 1, 1], [], []>} : vector<8x8xbf16>, vector<8x8xbf16>, vector<8x8xf32> -> vector<8x8xf32>
    %c0_25 = arith.constant 0 : index
    %c0_26 = arith.constant 0 : index
    %c16 = arith.constant 16 : index
    %45 = vector.load %arg2[%c0_25, %c0_26, %c16] : memref<1x8x32xbf16, #tpu.memory_space<vmem>>, vector<1x8x8xbf16>
    %46 = vector.shape_cast %45 : vector<1x8x8xbf16> to vector<8x8xbf16>
    %cst_27 = arith.constant 3.535160e-01 : bf16
    %47 = vector.broadcast %cst_27 : bf16 to vector<8x8xbf16>
    %48 = arith.mulf %46, %47 : vector<8x8xbf16>
    %c0_28 = arith.constant 0 : index
    %c0_29 = arith.constant 0 : index
    %c16_30 = arith.constant 16 : index
    %49 = vector.load %arg3[%c0_28, %c0_29, %c16_30] : memref<1x8x64xbf16, #tpu.memory_space<vmem>>, vector<1x8x8xbf16>
    %50 = vector.shape_cast %49 : vector<1x8x8xbf16> to vector<8x8xbf16>
    %c0_31 = arith.constant 0 : index
    %c0_32 = arith.constant 0 : index
    %c48 = arith.constant 48 : index
    %51 = vector.load %arg3[%c0_31, %c0_32, %c48] : memref<1x8x64xbf16, #tpu.memory_space<vmem>>, vector<1x8x8xbf16>
    %52 = vector.shape_cast %51 : vector<1x8x8xbf16> to vector<8x8xbf16>
    %cst_33 = arith.constant dense<0.000000e+00> : vector<8x8xf32>
    %53 = tpu.matmul %48, %50, %cst_33 {dimension_numbers = #tpu.dot_dimension_numbers<[1], [1], [0], [0], [0, 0, 1, 0], [], []>} : vector<8x8xbf16>, vector<8x8xbf16>, vector<8x8xf32> -> vector<8x8xf32>
    %54 = arith.addf %53, %0 : vector<8x8xf32>
    %cst_34 = arith.constant dense<0xFF800000> : vector<8xf32>
    %55 = vector.multi_reduction <maximumf>, %54, %cst_34 [1] : vector<8x8xf32> to vector<8xf32>
    %56 = vector.shape_cast %55 : vector<8xf32> to vector<8x1xf32>
    %57 = vector.broadcast %56 : vector<8x1xf32> to vector<8x8xf32>
    %58 = arith.subf %54, %57 : vector<8x8xf32>
    %59 = math.exp %58 : vector<8x8xf32>
    %cst_35 = arith.constant dense<0.000000e+00> : vector<8xf32>
    %60 = vector.multi_reduction <add>, %59, %cst_35 [1] : vector<8x8xf32> to vector<8xf32>
    %61 = vector.shape_cast %60 : vector<8xf32> to vector<8x1xf32>
    %62 = tpu.reciprocal %61 {approx = true} : vector<8x1xf32> -> vector<8x1xf32>
    %63 = vector.broadcast %62 : vector<8x1xf32> to vector<8x8xf32>
    %64 = arith.mulf %59, %63 : vector<8x8xf32>
    %65 = arith.truncf %64 : vector<8x8xf32> to vector<8x8xbf16>
    %cst_36 = arith.constant dense<0.000000e+00> : vector<8x8xf32>
    %66 = tpu.matmul %65, %52, %cst_36 {dimension_numbers = #tpu.dot_dimension_numbers<[1], [0], [0], [1], [0, 0, 1, 1], [], []>} : vector<8x8xbf16>, vector<8x8xbf16>, vector<8x8xf32> -> vector<8x8xf32>
    %c0_37 = arith.constant 0 : index
    %c0_38 = arith.constant 0 : index
    %c24 = arith.constant 24 : index
    %67 = vector.load %arg2[%c0_37, %c0_38, %c24] : memref<1x8x32xbf16, #tpu.memory_space<vmem>>, vector<1x8x8xbf16>
    %68 = vector.shape_cast %67 : vector<1x8x8xbf16> to vector<8x8xbf16>
    %cst_39 = arith.constant 3.535160e-01 : bf16
    %69 = vector.broadcast %cst_39 : bf16 to vector<8x8xbf16>
    %70 = arith.mulf %68, %69 : vector<8x8xbf16>
    %c0_40 = arith.constant 0 : index
    %c0_41 = arith.constant 0 : index
    %c24_42 = arith.constant 24 : index
    %71 = vector.load %arg3[%c0_40, %c0_41, %c24_42] : memref<1x8x64xbf16, #tpu.memory_space<vmem>>, vector<1x8x8xbf16>
    %72 = vector.shape_cast %71 : vector<1x8x8xbf16> to vector<8x8xbf16>
    %c0_43 = arith.constant 0 : index
    %c0_44 = arith.constant 0 : index
    %c56 = arith.constant 56 : index
    %73 = vector.load %arg3[%c0_43, %c0_44, %c56] : memref<1x8x64xbf16, #tpu.memory_space<vmem>>, vector<1x8x8xbf16>
    %74 = vector.shape_cast %73 : vector<1x8x8xbf16> to vector<8x8xbf16>
    %cst_45 = arith.constant dense<0.000000e+00> : vector<8x8xf32>
    %75 = tpu.matmul %70, %72, %cst_45 {dimension_numbers = #tpu.dot_dimension_numbers<[1], [1], [0], [0], [0, 0, 1, 0], [], []>} : vector<8x8xbf16>, vector<8x8xbf16>, vector<8x8xf32> -> vector<8x8xf32>
    %76 = arith.addf %75, %0 : vector<8x8xf32>
    %cst_46 = arith.constant dense<0xFF800000> : vector<8xf32>
    %77 = vector.multi_reduction <maximumf>, %76, %cst_46 [1] : vector<8x8xf32> to vector<8xf32>
    %78 = vector.shape_cast %77 : vector<8xf32> to vector<8x1xf32>
    %79 = vector.broadcast %78 : vector<8x1xf32> to vector<8x8xf32>
    %80 = arith.subf %76, %79 : vector<8x8xf32>
    %81 = math.exp %80 : vector<8x8xf32>
    %cst_47 = arith.constant dense<0.000000e+00> : vector<8xf32>
    %82 = vector.multi_reduction <add>, %81, %cst_47 [1] : vector<8x8xf32> to vector<8xf32>
    %83 = vector.shape_cast %82 : vector<8xf32> to vector<8x1xf32>
    %84 = tpu.reciprocal %83 {approx = true} : vector<8x1xf32> -> vector<8x1xf32>
    %85 = vector.broadcast %84 : vector<8x1xf32> to vector<8x8xf32>
    %86 = arith.mulf %81, %85 : vector<8x8xf32>
    %87 = arith.truncf %86 : vector<8x8xf32> to vector<8x8xbf16>
    %cst_48 = arith.constant dense<0.000000e+00> : vector<8x8xf32>
    %88 = tpu.matmul %87, %74, %cst_48 {dimension_numbers = #tpu.dot_dimension_numbers<[1], [0], [0], [1], [0, 0, 1, 1], [], []>} : vector<8x8xbf16>, vector<8x8xbf16>, vector<8x8xf32> -> vector<8x8xf32>
    %89 = tpu.concatenate %22, %44, %66, %88 in 1 : vector<8x8xf32>, vector<8x8xf32>, vector<8x8xf32>, vector<8x8xf32> -> vector<8x32xf32>
    %90 = arith.truncf %89 : vector<8x32xf32> to vector<8x32xbf16>
    %c0_49 = arith.constant 0 : index
    %c0_50 = arith.constant 0 : index
    %c0_51 = arith.constant 0 : index
    %91 = vector.load %arg5[%c0_49, %c0_50, %c0_51] : memref<1x8x32xbf16, #tpu.memory_space<vmem>>, vector<1x8x32xbf16>
    %92 = vector.shape_cast %91 : vector<1x8x32xbf16> to vector<8x32xbf16>
    %93 = vector.shape_cast %90 : vector<8x32xbf16> to vector<1x8x32xbf16>
    tpu.vector_store %arg5[%c0_49, %c0_50, %c0_51], %93 {strides = array<i32>} : memref<1x8x32xbf16, #tpu.memory_space<vmem>>, vector<1x8x32xbf16>,
    return
  }
  func.func @transform_0(%arg0: i32, %arg1: i32) -> (i32, i32, i32) {
    %c0_i32 = arith.constant 0 : i32
    %c0_i32_0 = arith.constant 0 : i32
    return %arg0, %arg1, %c0_i32 : i32, i32, i32
  }
  func.func @transform_1(%arg0: i32, %arg1: i32) -> (i32, i32, i32) {
    %c0_i32 = arith.constant 0 : i32
    %c0_i32_0 = arith.constant 0 : i32
    %c0_i32_1 = arith.constant 0 : i32
    return %arg0, %c0_i32, %c0_i32_0 : i32, i32, i32
  }
  func.func @transform_2(%arg0: i32, %arg1: i32) -> (i32, i32) {
    %c0_i32 = arith.constant 0 : i32
    %c0_i32_0 = arith.constant 0 : i32
    return %arg1, %c0_i32 : i32, i32
  }
  func.func @transform_3(%arg0: i32, %arg1: i32) -> (i32, i32, i32) {
    %c0_i32 = arith.constant 0 : i32
    %c0_i32_0 = arith.constant 0 : i32
    return %arg0, %arg1, %c0_i32 : i32, i32, i32
  }
}

module attributes {stable_mosaic.version = 11 : i64} {
  func.func @_ffn_add_ln_kernel(%arg0: i32, %arg1: i32, %arg2: memref<16x32xbf16, #tpu.memory_space<vmem>>, %arg3: memref<32x64xbf16, #tpu.memory_space<vmem>>, %arg4: memref<1x64xf32, #tpu.memory_space<vmem>>, %arg5: memref<64x32xbf16, #tpu.memory_space<vmem>>, %arg6: memref<1x32xf32, #tpu.memory_space<vmem>>, %arg7: memref<1x32xf32, #tpu.memory_space<vmem>>, %arg8: memref<1x32xf32, #tpu.memory_space<vmem>>, %arg9: memref<16x32xbf16, #tpu.memory_space<vmem>>, %arg10: memref<16x32xf32, #tpu.memory_space<vmem>>) attributes {dimension_semantics = [#tpu.dimension_semantics<parallel>, #tpu.dimension_semantics<arbitrary>], iteration_bounds = array<i64: 1, 1>, scalar_prefetch = 0 : i64, scratch_operands = 1 : i64, tpu.core_type = #tpu.core_type<tc>, window_params = [{transform_indices = @transform_0, window_bounds = array<i64: 16, 32>}, {transform_indices = @transform_1, window_bounds = array<i64: 32, 64>}, {transform_indices = @transform_2, window_bounds = array<i64: 1, 64>}, {transform_indices = @transform_3, window_bounds = array<i64: 64, 32>}, {pipeline_mode = #tpu.pipeline_mode<synchronous>, transform_indices = @transform_4, window_bounds = array<i64: 1, 32>}, {pipeline_mode = #tpu.pipeline_mode<synchronous>, transform_indices = @transform_5, window_bounds = array<i64: 1, 32>}, {pipeline_mode = #tpu.pipeline_mode<synchronous>, transform_indices = @transform_6, window_bounds = array<i64: 1, 32>}, {transform_indices = @transform_7, window_bounds = array<i64: 16, 32>}]} {
    %c0_i32 = arith.constant 0 : i32
    %0 = arith.cmpi eq, %arg1, %c0_i32 : i32
    %1 = arith.extui %0 : i1 to i32
    %c0_i32_0 = arith.constant 0 : i32
    %2 = arith.cmpi ne, %1, %c0_i32_0 : i32
    scf.if %2 {
      %cst_16 = arith.constant 0.000000e+00 : f32
      %20 = vector.broadcast %cst_16 : f32 to vector<16x32xf32>
      %c0_17 = arith.constant 0 : index
      %c0_18 = arith.constant 0 : index
      %21 = vector.load %arg10[%c0_17, %c0_18] : memref<16x32xf32, #tpu.memory_space<vmem>>, vector<16x32xf32>
      tpu.vector_store %arg10[%c0_17, %c0_18], %20 {strides = array<i32>} : memref<16x32xf32, #tpu.memory_space<vmem>>, vector<16x32xf32>,
    } else {
    }
    %c0 = arith.constant 0 : index
    %c0_1 = arith.constant 0 : index
    %3 = vector.load %arg2[%c0, %c0_1] : memref<16x32xbf16, #tpu.memory_space<vmem>>, vector<16x32xbf16>
    %c0_2 = arith.constant 0 : index
    %c0_3 = arith.constant 0 : index
    %4 = vector.load %arg3[%c0_2, %c0_3] : memref<32x64xbf16, #tpu.memory_space<vmem>>, vector<32x64xbf16>
    %cst = arith.constant dense<0.000000e+00> : vector<16x64xf32>
    %5 = tpu.matmul %3, %4, %cst {dimension_numbers = #tpu.dot_dimension_numbers<[1], [0], [0], [1], [0, 0, 1, 1], [], []>} : vector<16x32xbf16>, vector<32x64xbf16>, vector<16x64xf32> -> vector<16x64xf32>
    %c0_4 = arith.constant 0 : index
    %c0_5 = arith.constant 0 : index
    %6 = vector.load %arg4[%c0_4, %c0_5] : memref<1x64xf32, #tpu.memory_space<vmem>>, vector<1x64xf32>
    %7 = vector.broadcast %6 : vector<1x64xf32> to vector<16x64xf32>
    %8 = arith.addf %5, %7 : vector<16x64xf32>
    %cst_6 = arith.constant 0.000000e+00 : f32
    %9 = vector.broadcast %cst_6 : f32 to vector<16x64xf32>
    %10 = arith.maximumf %8, %9 : vector<16x64xf32>
    %c0_7 = arith.constant 0 : index
    %c0_8 = arith.constant 0 : index
    %11 = vector.load %arg10[%c0_7, %c0_8] : memref<16x32xf32, #tpu.memory_space<vmem>>, vector<16x32xf32>
    %12 = arith.truncf %10 : vector<16x64xf32> to vector<16x64xbf16>
    %c0_9 = arith.constant 0 : index
    %c0_10 = arith.constant 0 : index
    %13 = vector.load %arg5[%c0_9, %c0_10] : memref<64x32xbf16, #tpu.memory_space<vmem>>, vector<64x32xbf16>
    %cst_11 = arith.constant dense<0.000000e+00> : vector<16x32xf32>
    %14 = tpu.matmul %12, %13, %cst_11 {dimension_numbers = #tpu.dot_dimension_numbers<[1], [0], [0], [1], [0, 0, 1, 1], [], []>} : vector<16x64xbf16>, vector<64x32xbf16>, vector<16x32xf32> -> vector<16x32xf32>
    %15 = arith.addf %11, %14 : vector<16x32xf32>
    %c0_12 = arith.constant 0 : index
    %c0_13 = arith.constant 0 : index
    %16 = vector.load %arg10[%c0_12, %c0_13] : memref<16x32xf32, #tpu.memory_space<vmem>>, vector<16x32xf32>
    tpu.vector_store %arg10[%c0_12, %c0_13], %15 {strides = array<i32>} : memref<16x32xf32, #tpu.memory_space<vmem>>, vector<16x32xf32>,
    %c0_i32_14 = arith.constant 0 : i32
    %17 = arith.cmpi eq, %arg1, %c0_i32_14 : i32
    %18 = arith.extui %17 : i1 to i32
    %c0_i32_15 = arith.constant 0 : i32
    %19 = arith.cmpi ne, %18, %c0_i32_15 : i32
    scf.if %19 {
      %c0_16 = arith.constant 0 : index
      %c0_17 = arith.constant 0 : index
      %20 = vector.load %arg10[%c0_16, %c0_17] : memref<16x32xf32, #tpu.memory_space<vmem>>, vector<16x32xf32>
      %c0_18 = arith.constant 0 : index
      %c0_19 = arith.constant 0 : index
      %21 = vector.load %arg6[%c0_18, %c0_19] : memref<1x32xf32, #tpu.memory_space<vmem>>, vector<1x32xf32>
      %22 = vector.broadcast %21 : vector<1x32xf32> to vector<16x32xf32>
      %23 = arith.addf %20, %22 : vector<16x32xf32>
      %c0_20 = arith.constant 0 : index
      %c0_21 = arith.constant 0 : index
      %24 = vector.load %arg2[%c0_20, %c0_21] : memref<16x32xbf16, #tpu.memory_space<vmem>>, vector<16x32xbf16>
      %25 = arith.extf %24 : vector<16x32xbf16> to vector<16x32xf32>
      %26 = arith.addf %23, %25 : vector<16x32xf32>
      %cst_22 = arith.constant dense<0.000000e+00> : vector<16xf32>
      %27 = vector.multi_reduction <add>, %26, %cst_22 [1] : vector<16x32xf32> to vector<16xf32>
      %28 = vector.shape_cast %27 : vector<16xf32> to vector<16x1xf32>
      %cst_23 = arith.constant 3.200000e+01 : f32
      %29 = vector.broadcast %cst_23 : f32 to vector<16x1xf32>
      %30 = arith.divf %28, %29 : vector<16x1xf32>
      %31 = vector.broadcast %30 : vector<16x1xf32> to vector<16x32xf32>
      %32 = arith.subf %26, %31 : vector<16x32xf32>
      %33 = arith.mulf %32, %32 : vector<16x32xf32>
      %cst_24 = arith.constant dense<0.000000e+00> : vector<16xf32>
      %34 = vector.multi_reduction <add>, %33, %cst_24 [1] : vector<16x32xf32> to vector<16xf32>
      %35 = vector.shape_cast %34 : vector<16xf32> to vector<16x1xf32>
      %cst_25 = arith.constant 3.200000e+01 : f32
      %36 = vector.broadcast %cst_25 : f32 to vector<16x1xf32>
      %37 = arith.divf %35, %36 : vector<16x1xf32>
      %38 = vector.broadcast %30 : vector<16x1xf32> to vector<16x32xf32>
      %39 = arith.subf %26, %38 : vector<16x32xf32>
      %cst_26 = arith.constant 9.99999974E-6 : f32
      %40 = vector.broadcast %cst_26 : f32 to vector<16x1xf32>
      %41 = arith.addf %37, %40 : vector<16x1xf32>
      %42 = math.rsqrt %41 : vector<16x1xf32>
      %43 = vector.broadcast %42 : vector<16x1xf32> to vector<16x32xf32>
      %44 = arith.mulf %39, %43 : vector<16x32xf32>
      %c0_27 = arith.constant 0 : index
      %c0_28 = arith.constant 0 : index
      %45 = vector.load %arg7[%c0_27, %c0_28] : memref<1x32xf32, #tpu.memory_space<vmem>>, vector<1x32xf32>
      %46 = vector.broadcast %45 : vector<1x32xf32> to vector<16x32xf32>
      %47 = arith.mulf %44, %46 : vector<16x32xf32>
      %c0_29 = arith.constant 0 : index
      %c0_30 = arith.constant 0 : index
      %48 = vector.load %arg8[%c0_29, %c0_30] : memref<1x32xf32, #tpu.memory_space<vmem>>, vector<1x32xf32>
      %49 = vector.broadcast %48 : vector<1x32xf32> to vector<16x32xf32>
      %50 = arith.addf %47, %49 : vector<16x32xf32>
      %51 = arith.truncf %50 : vector<16x32xf32> to vector<16x32xbf16>
      %c0_31 = arith.constant 0 : index
      %c0_32 = arith.constant 0 : index
      %52 = vector.load %arg9[%c0_31, %c0_32] : memref<16x32xbf16, #tpu.memory_space<vmem>>, vector<16x32xbf16>
      tpu.vector_store %arg9[%c0_31, %c0_32], %51 {strides = array<i32>} : memref<16x32xbf16, #tpu.memory_space<vmem>>, vector<16x32xbf16>,
    } else {
    }
    return
  }
  func.func @transform_0(%arg0: i32, %arg1: i32) -> (i32, i32) {
    %c0_i32 = arith.constant 0 : i32
    %c0_i32_0 = arith.constant 0 : i32
    return %arg0, %c0_i32 : i32, i32
  }
  func.func @transform_1(%arg0: i32, %arg1: i32) -> (i32, i32) {
    %c0_i32 = arith.constant 0 : i32
    %c0_i32_0 = arith.constant 0 : i32
    return %c0_i32, %arg1 : i32, i32
  }
  func.func @transform_2(%arg0: i32, %arg1: i32) -> (i32, i32) {
    %c0_i32 = arith.constant 0 : i32
    %c0_i32_0 = arith.constant 0 : i32
    return %c0_i32, %arg1 : i32, i32
  }
  func.func @transform_3(%arg0: i32, %arg1: i32) -> (i32, i32) {
    %c0_i32 = arith.constant 0 : i32
    %c0_i32_0 = arith.constant 0 : i32
    return %arg1, %c0_i32 : i32, i32
  }
  func.func @transform_4(%arg0: i32, %arg1: i32) -> (i32, i32) {
    %c0_i32 = arith.constant 0 : i32
    %c0_i32_0 = arith.constant 0 : i32
    %c0_i32_1 = arith.constant 0 : i32
    return %c0_i32, %c0_i32_0 : i32, i32
  }
  func.func @transform_5(%arg0: i32, %arg1: i32) -> (i32, i32) {
    %c0_i32 = arith.constant 0 : i32
    %c0_i32_0 = arith.constant 0 : i32
    %c0_i32_1 = arith.constant 0 : i32
    return %c0_i32, %c0_i32_0 : i32, i32
  }
  func.func @transform_6(%arg0: i32, %arg1: i32) -> (i32, i32) {
    %c0_i32 = arith.constant 0 : i32
    %c0_i32_0 = arith.constant 0 : i32
    %c0_i32_1 = arith.constant 0 : i32
    return %c0_i32, %c0_i32_0 : i32, i32
  }
  func.func @transform_7(%arg0: i32, %arg1: i32) -> (i32, i32) {
    %c0_i32 = arith.constant 0 : i32
    %c0_i32_0 = arith.constant 0 : i32
    return %arg0, %c0_i32 : i32, i32
  }
}

module attributes {stable_mosaic.version = 11 : i64} {
  func.func @_ln_kernel(%arg0: i32, %arg1: memref<16x32xbf16, #tpu.memory_space<vmem>>, %arg2: memref<1x32xf32, #tpu.memory_space<vmem>>, %arg3: memref<1x32xf32, #tpu.memory_space<vmem>>, %arg4: memref<16x32xf32, #tpu.memory_space<vmem>>) attributes {dimension_semantics = [#tpu.dimension_semantics<parallel>], iteration_bounds = array<i64: 1>, scalar_prefetch = 0 : i64, scratch_operands = 0 : i64, tpu.core_type = #tpu.core_type<tc>, window_params = [{transform_indices = @transform_0, window_bounds = array<i64: 16, 32>}, {pipeline_mode = #tpu.pipeline_mode<synchronous>, transform_indices = @transform_1, window_bounds = array<i64: 1, 32>}, {pipeline_mode = #tpu.pipeline_mode<synchronous>, transform_indices = @transform_2, window_bounds = array<i64: 1, 32>}, {transform_indices = @transform_3, window_bounds = array<i64: 16, 32>}]} {
    %c0 = arith.constant 0 : index
    %c0_0 = arith.constant 0 : index
    %0 = vector.load %arg1[%c0, %c0_0] : memref<16x32xbf16, #tpu.memory_space<vmem>>, vector<16x32xbf16>
    %1 = arith.extf %0 : vector<16x32xbf16> to vector<16x32xf32>
    %cst = arith.constant dense<0.000000e+00> : vector<16xf32>
    %2 = vector.multi_reduction <add>, %1, %cst [1] : vector<16x32xf32> to vector<16xf32>
    %3 = vector.shape_cast %2 : vector<16xf32> to vector<16x1xf32>
    %cst_1 = arith.constant 3.200000e+01 : f32
    %4 = vector.broadcast %cst_1 : f32 to vector<16x1xf32>
    %5 = arith.divf %3, %4 : vector<16x1xf32>
    %6 = vector.broadcast %5 : vector<16x1xf32> to vector<16x32xf32>
    %7 = arith.subf %1, %6 : vector<16x32xf32>
    %8 = arith.mulf %7, %7 : vector<16x32xf32>
    %cst_2 = arith.constant dense<0.000000e+00> : vector<16xf32>
    %9 = vector.multi_reduction <add>, %8, %cst_2 [1] : vector<16x32xf32> to vector<16xf32>
    %10 = vector.shape_cast %9 : vector<16xf32> to vector<16x1xf32>
    %cst_3 = arith.constant 3.200000e+01 : f32
    %11 = vector.broadcast %cst_3 : f32 to vector<16x1xf32>
    %12 = arith.divf %10, %11 : vector<16x1xf32>
    %13 = vector.broadcast %5 : vector<16x1xf32> to vector<16x32xf32>
    %14 = arith.subf %1, %13 : vector<16x32xf32>
    %cst_4 = arith.constant 9.99999974E-6 : f32
    %15 = vector.broadcast %cst_4 : f32 to vector<16x1xf32>
    %16 = arith.addf %12, %15 : vector<16x1xf32>
    %17 = math.rsqrt %16 : vector<16x1xf32>
    %18 = vector.broadcast %17 : vector<16x1xf32> to vector<16x32xf32>
    %19 = arith.mulf %14, %18 : vector<16x32xf32>
    %c0_5 = arith.constant 0 : index
    %c0_6 = arith.constant 0 : index
    %20 = vector.load %arg2[%c0_5, %c0_6] : memref<1x32xf32, #tpu.memory_space<vmem>>, vector<1x32xf32>
    %21 = vector.broadcast %20 : vector<1x32xf32> to vector<16x32xf32>
    %22 = arith.mulf %19, %21 : vector<16x32xf32>
    %c0_7 = arith.constant 0 : index
    %c0_8 = arith.constant 0 : index
    %23 = vector.load %arg3[%c0_7, %c0_8] : memref<1x32xf32, #tpu.memory_space<vmem>>, vector<1x32xf32>
    %24 = vector.broadcast %23 : vector<1x32xf32> to vector<16x32xf32>
    %25 = arith.addf %22, %24 : vector<16x32xf32>
    %c0_9 = arith.constant 0 : index
    %c0_10 = arith.constant 0 : index
    %26 = vector.load %arg4[%c0_9, %c0_10] : memref<16x32xf32, #tpu.memory_space<vmem>>, vector<16x32xf32>
    tpu.vector_store %arg4[%c0_9, %c0_10], %25 {strides = array<i32>} : memref<16x32xf32, #tpu.memory_space<vmem>>, vector<16x32xf32>,
    return
  }
  func.func @transform_0(%arg0: i32) -> (i32, i32) {
    %c0_i32 = arith.constant 0 : i32
    %c0_i32_0 = arith.constant 0 : i32
    return %arg0, %c0_i32 : i32, i32
  }
  func.func @transform_1(%arg0: i32) -> (i32, i32) {
    %c0_i32 = arith.constant 0 : i32
    %c0_i32_0 = arith.constant 0 : i32
    %c0_i32_1 = arith.constant 0 : i32
    return %c0_i32, %c0_i32_0 : i32, i32
  }
  func.func @transform_2(%arg0: i32) -> (i32, i32) {
    %c0_i32 = arith.constant 0 : i32
    %c0_i32_0 = arith.constant 0 : i32
    %c0_i32_1 = arith.constant 0 : i32
    return %c0_i32, %c0_i32_0 : i32, i32
  }
  func.func @transform_3(%arg0: i32) -> (i32, i32) {
    %c0_i32 = arith.constant 0 : i32
    %c0_i32_0 = arith.constant 0 : i32
    return %arg0, %c0_i32 : i32, i32
  }
}

</mosaic_0001>

<bundles_post_ra>
// kernel: transformer_decoder_forward.19
= control target key start
LH: loop header
LB: loop body
LE: loop exit
PB: predicated region body
PF: predicated region fallthrough
CT: control target
= control target key end

     0   :  { %8 = vsyncpa [#allocation4], 0  ;;  %s401_s0 = inlined_call_operand.hbm [shape: bf16[16,32], index: 0, kind: input, shape index: {}]   ;;  %s402_s1 = inlined_call_operand.hbm [shape: bf16[32,32], index: 1, kind: input, shape index: {}]   ;;  %s403_s2 = inlined_call_operand.hbm [shape: f32[1,32], index: 2, kind: input, shape index: {}]   ;;  %s404_s3 = inlined_call_operand.hbm [shape: bf16[16,32], index: 3, kind: output, shape index: {}]  }
   0x1   :  { %9 = vsyncpa [#allocation7], 0 }
   0x2   :  { %10 = vsyncpa [#allocation5], 0  ;;  %s304_s12 = smov [#allocation6]   ;;  %s305_s14 = smov [#allocation3]  }
   0x3   :  { %s28_s13 = sshll.u32 %s304_s12, 4  ;;  %s16_s15 = sshll.u32 %s305_s14, 4  ;;  %s29_s13 = int_to_ptr.vmem [resolvable:$true] %s28_s13  ;;  %s332_s15 = int_to_ptr.vmem [resolvable:$true] %s16_s15 }
   0x4   :  { %s210_s18 = scalar_lea.hbm %s402_s1, 256 }
   0x5   :  { %p211_p0 = scmp.ne.s32.totalorder %s402_s1, %s210_s18  ;;  %p214_p1 = scmp.lt.u32.totalorder %s210_s18, %s402_s1 }
   0x7   :  { %p216_p2 = pnand %p214_p1, %p211_p0 }
   0x9   :  { %219 = shalt.err (!%p216_p2)
}
   0xa   :  { %s220_s23 = scalar_lea.vmem %s29_s13, 256  ;;  %p225_p4 = scmp.lt.s32.totalorder %s29_s13, %s29_s13 }
   0xb   :  { %p221_p3 = scmp.ne.s32.totalorder %s29_s13, %s220_s23  ;;  %p226_p5 = scmp.lt.s32.totalorder %s220_s23, %s220_s23 }
   0xd   :  { %p227_p6 = por %p226_p5, %p225_p4 }
   0xf   :  { %p228_p7 = pnand %p227_p6, %p221_p3 }
  0x11   :  { %231 = shalt.err (!%p228_p7)
}
  0x12   :  { %s306_s24 = smov 64   ;;  %s307_s25 = smov 4  }
  0x13   :  { %34 = dma.hbm_to_vmem [thread:$0]  %s402_s1, 256, %s29_s13, [#allocation7], %s306_s24, %s306_s24, %s307_s25  }
  0x14   :  { %s232_s30 = scalar_lea.hbm %s401_s0, 128 }
  0x15   :  { %p233_p8 = scmp.ne.s32.totalorder %s401_s0, %s232_s30  ;;  %p236_p9 = scmp.lt.u32.totalorder %s232_s30, %s401_s0 }
  0x17   :  { %p238_p10 = pnand %p236_p9, %p233_p8 }
  0x19   :  { %241 = shalt.err (!%p238_p10)
}
  0x1a   :  { %s242_s8 = scalar_lea.vmem %s332_s15, 128  ;;  %p247_p12 = scmp.lt.s32.totalorder %s332_s15, %s332_s15 }
  0x1b   :  { %p243_p11 = scmp.ne.s32.totalorder %s332_s15, %s242_s8  ;;  %p248_p13 = scmp.lt.s32.totalorder %s242_s8, %s242_s8 }
  0x1d   :  { %p249_p0 = por %p248_p13, %p247_p12 }
  0x1f   :  { %p250_p1 = pnand %p249_p0, %p243_p11 }
  0x21   :  { %253 = shalt.err (!%p250_p1)
}
  0x22   :  { %22 = dma.hbm_to_vmem [thread:$0]  %s401_s0, 128, %s332_s15, [#allocation4], %s306_s24, %s306_s24, %s307_s25  }
  0x23   :  { %s308_s10 = smov [#allocation8]   ;;  %s254_s14 = scalar_lea.hbm %s403_s2, 16 }
  0x24   :  { %s41_s11 = sshll.u32 %s308_s10, 4  ;;  %p255_p2 = scmp.ne.s32.totalorder %s403_s2, %s254_s14  ;;  %s42_s11 = int_to_ptr.vmem [resolvable:$true] %s41_s11 }
  0x25   :  { %p258_p3 = scmp.lt.u32.totalorder %s254_s14, %s403_s2 }
  0x27   :  { %p260_p4 = pnand %p258_p3, %p255_p2 }
  0x29   :  { %263 = shalt.err (!%p260_p4)
}
  0x2a   :  { %s264_s20 = scalar_lea.vmem %s42_s11, 16  ;;  %s268_s0 = scalar_lea.vmem %s42_s11, 32 }
  0x2b   :  { %p265_p5 = scmp.ne.s32.totalorder %s42_s11, %s264_s20  ;;  %p269_p6 = scmp.lt.s32.totalorder %s42_s11, %s42_s11 }
  0x2c   :  { %p270_p7 = scmp.lt.s32.totalorder %s268_s0, %s264_s20 }
  0x2e   :  { %p271_p8 = por %p270_p7, %p269_p6 }
  0x30   :  { %p272_p9 = pnand %p271_p8, %p265_p5 }
  0x32   :  { %275 = shalt.err (!%p272_p9)
}
  0x33   :  { %44 = dma.hbm_to_vmem [thread:$0]  %s403_s2, 16, %s42_s11, [#allocation7]  }
  0x34   :  { %298 = dma.done.wait [#allocation4], 128  }
  0x35   :  { %299 = vsyncadd [#allocation4], 4294967168 }
  0x36   :  { %300 = dma.done.wait [#allocation7], 272  }
  0x37   :  { %301 = vsyncadd [#allocation7], 4294967024  ;;  %vm59_vm0 = vcmask 261120   ;;  %v309_v0 = vmov 0.0   ;;  %vm310_vm1 = vmmov 0   ;;  %v207_v1 = vld [vmem:[#allocation6] sm:$0xff]  }
  0x38   :  { %191 = vmatprep.subr.bf16.mxu0 %v309_v0  ;;  %195 = vmatprep.mubr.msk.bf16.mxu0 %vm310_vm1, %v309_v0  ;;  %60 = vst.msk [vmem:[#allocation2] sm:$0xff] %vm59_vm0, %v309_v0  ;;  %61 = vst.msk [vmem:[#allocation2 + $0x8] sm:$0xff] %vm59_vm0, %v309_v0  ;;  %v208_v2 = vld [vmem:[#allocation6 + $0x8] sm:$0xff]   ;;  %v209_v3 = vld [vmem:[#allocation3] sm:$0xff]   ;;  %vm158_vm2 = vcmask 257024   ;;  %s311_s2 = smov [#allocation9]  }
  0x39   :  { %192 = vmatpush3.bf16.msra.mxu0 %v207_v1  ;;  %v183_v12 = vld [vmem:[#allocation8] ss:$0 sm:$0xff]  ;;  %s166_s22 = sshll.u32 %s311_s2, 4  ;;  %s167_s22 = int_to_ptr.vmem [resolvable:$true] %s166_s22 }
  0x3a   :  { %193 = vmatprep.subr.bf16.mxu0 %v309_v0  ;;  %s276_s23 = scalar_lea.vmem %s167_s22, 128  ;;  %p281_p11 = scmp.lt.s32.totalorder %s167_s22, %s167_s22 }
  0x3b   :  { %p277_p10 = scmp.ne.s32.totalorder %s167_s22, %s276_s23  ;;  %p282_p12 = scmp.lt.s32.totalorder %s276_s23, %s276_s23 }
  0x3d   :  { %194 = vmatpush3.bf16.msra.mxu0 %v208_v2  ;;  %p283_p13 = por %p282_p12, %p281_p11 }
  0x3f   :  { %v62_v4 = vld [vmem:[#allocation2] sm:$0xff]  ;;  %v63_v6 = vld [vmem:[#allocation2 + $0x8] sm:$0xff]  ;;  %p284_p0 = pnand %p283_p13, %p277_p10 }
  0x40   :  { %196 = vmatmul.mubr.msk.bf16.vlgmr.msra.gmra.mrb[0].mxu0 %vm59_vm0, %v209_v3 }
 0x113   :  { %v125_v5 = vpop.f32.mrb[0].mxu0 }
 0x114   :  { %v132_v7 = vadd.f32 %v125_v5, %v62_v4  ;;  %v197_v8 = vpop.f32.mrb[1].mxu0 }
 0x115   :  { %v128_v9 = vpop.f32.mrb[2].mxu0 }
 0x116   :  { %134 = vst.msk [vmem:[#allocation2] sm:$0xff] %vm59_vm0, %v132_v7  ;;  %v133_v10 = vadd.f32 %v128_v9, %v63_v6  ;;  %v198_v11 = vpop.f32.mrb[3].mxu0 }
 0x118   :  { %135 = vst.msk [vmem:[#allocation2 + $0x8] sm:$0xff] %vm59_vm0, %v133_v10 }
 0x11d   :  { %v139_v13 = vld [vmem:[#allocation2] sm:$0xff] }
 0x11e   :  { %v148_v14 = vadd.f32 %v183_v12, %v139_v13 }
 0x11f   :  { %v140_v15 = vld [vmem:[#allocation2 + $0x8] sm:$0xff] }
 0x120   :  { %v149_v16 = vadd.f32 %v183_v12, %v140_v15  ;;  %v186_v17 = vpack.c.bf16 %v148_v14, %v148_v14 }
 0x122   :  { %v187_v18 = vpack.c.bf16 %v149_v16, %v149_v16  ;;  %159 = vst.msk [vmem:[#allocation9] sm:$0xf] %vm158_vm2, %v186_v17 }
 0x124   :  { %160 = vst.msk [vmem:[#allocation9 + $0x4] sm:$0xf] %vm158_vm2, %v187_v18 }
 0x125   :  { %287 = shalt.err (!%p284_p0)
}
 0x126   :  { %s288_s28 = scalar_lea.hbm %s404_s3, 128 }
 0x127   :  { %p289_p1 = scmp.ne.s32.totalorder %s404_s3, %s288_s28  ;;  %p292_p2 = scmp.lt.u32.totalorder %s288_s28, %s404_s3 }
 0x129   :  { %p294_p3 = pnand %p292_p2, %p289_p1 }
 0x12b   :  { %297 = shalt.err (!%p294_p3)
}
 0x12c   :  { %172 = dma.vmem_to_hbm [thread:$0]  %s167_s22, 128, %s404_s3, [#allocation5], %s306_s24, %s306_s24, %s307_s25  }
 0x12d   :  { %302 = dma.done.wait [#allocation5], 128  }
 0x12e   :  { %303 = vsyncadd [#allocation5], 4294967168 }
 0x12f   :  { %176 = vsyncpa [#allocation4], 1 }
 0x130   :  { %177 = vsyncpa [#allocation7], 1 }
 0x131   :  { %178 = vsyncpa [#allocation5], 1 }

// kernel: transformer_decoder_forward.33
= control target key start
LH: loop header
LB: loop body
LE: loop exit
PB: predicated region body
PF: predicated region fallthrough
CT: control target
= control target key end

     0   :  { %8 = vsyncpa [#allocation4], 0  ;;  %s401_s0 = inlined_call_operand.hbm [shape: bf16[16,32], index: 0, kind: input, shape index: {}]   ;;  %s402_s1 = inlined_call_operand.hbm [shape: bf16[32,64], index: 1, kind: input, shape index: {}]   ;;  %s403_s2 = inlined_call_operand.hbm [shape: f32[1,64], index: 2, kind: input, shape index: {}]   ;;  %s404_s3 = inlined_call_operand.hbm [shape: bf16[16,64], index: 3, kind: output, shape index: {}]  }
   0x1   :  { %9 = vsyncpa [#allocation7], 0 }
   0x2   :  { %10 = vsyncpa [#allocation5], 0  ;;  %s305_s12 = smov [#allocation6]   ;;  %s306_s14 = smov [#allocation3]  }
   0x3   :  { %s28_s13 = sshll.u32 %s305_s12, 4  ;;  %s16_s15 = sshll.u32 %s306_s14, 4  ;;  %s29_s13 = int_to_ptr.vmem [resolvable:$true] %s28_s13  ;;  %s333_s15 = int_to_ptr.vmem [resolvable:$true] %s16_s15 }
   0x4   :  { %s211_s18 = scalar_lea.hbm %s402_s1, 256 }
   0x5   :  { %p212_p0 = scmp.ne.s32.totalorder %s402_s1, %s211_s18  ;;  %p215_p1 = scmp.lt.u32.totalorder %s211_s18, %s402_s1 }
   0x7   :  { %p217_p2 = pnand %p215_p1, %p212_p0 }
   0x9   :  { %220 = shalt.err (!%p217_p2)
}
   0xa   :  { %s221_s23 = scalar_lea.vmem %s29_s13, 256  ;;  %p226_p4 = scmp.lt.s32.totalorder %s29_s13, %s29_s13 }
   0xb   :  { %p222_p3 = scmp.ne.s32.totalorder %s29_s13, %s221_s23  ;;  %p227_p5 = scmp.lt.s32.totalorder %s221_s23, %s221_s23 }
   0xd   :  { %p228_p6 = por %p227_p5, %p226_p4 }
   0xf   :  { %p229_p7 = pnand %p228_p6, %p222_p3 }
  0x11   :  { %232 = shalt.err (!%p229_p7)
}
  0x12   :  { %s307_s24 = smov 64   ;;  %s308_s25 = smov 4  }
  0x13   :  { %34 = dma.hbm_to_vmem [thread:$0]  %s402_s1, 256, %s29_s13, [#allocation7], %s307_s24, %s307_s24, %s308_s25  }
  0x14   :  { %s233_s30 = scalar_lea.hbm %s401_s0, 128 }
  0x15   :  { %p234_p8 = scmp.ne.s32.totalorder %s401_s0, %s233_s30  ;;  %p237_p9 = scmp.lt.u32.totalorder %s233_s30, %s401_s0 }
  0x17   :  { %p239_p10 = pnand %p237_p9, %p234_p8 }
  0x19   :  { %242 = shalt.err (!%p239_p10)
}
  0x1a   :  { %s243_s8 = scalar_lea.vmem %s333_s15, 128  ;;  %p248_p12 = scmp.lt.s32.totalorder %s333_s15, %s333_s15 }
  0x1b   :  { %p244_p11 = scmp.ne.s32.totalorder %s333_s15, %s243_s8  ;;  %p249_p13 = scmp.lt.s32.totalorder %s243_s8, %s243_s8 }
  0x1d   :  { %p250_p0 = por %p249_p13, %p248_p12 }
  0x1f   :  { %p251_p1 = pnand %p250_p0, %p244_p11 }
  0x21   :  { %254 = shalt.err (!%p251_p1)
}
  0x22   :  { %22 = dma.hbm_to_vmem [thread:$0]  %s401_s0, 128, %s333_s15, [#allocation4], %s307_s24, %s307_s24, %s308_s25  }
  0x23   :  { %s309_s10 = smov [#allocation8]   ;;  %s255_s14 = scalar_lea.hbm %s403_s2, 16 }
  0x24   :  { %s41_s11 = sshll.u32 %s309_s10, 4  ;;  %p256_p2 = scmp.ne.s32.totalorder %s403_s2, %s255_s14  ;;  %s42_s11 = int_to_ptr.vmem [resolvable:$true] %s41_s11 }
  0x25   :  { %p259_p3 = scmp.lt.u32.totalorder %s255_s14, %s403_s2 }
  0x27   :  { %p261_p4 = pnand %p259_p3, %p256_p2 }
  0x29   :  { %264 = shalt.err (!%p261_p4)
}
  0x2a   :  { %s265_s20 = scalar_lea.vmem %s42_s11, 16  ;;  %s269_s0 = scalar_lea.vmem %s42_s11, 32 }
  0x2b   :  { %p266_p5 = scmp.ne.s32.totalorder %s42_s11, %s265_s20  ;;  %p270_p6 = scmp.lt.s32.totalorder %s42_s11, %s42_s11 }
  0x2c   :  { %p271_p7 = scmp.lt.s32.totalorder %s269_s0, %s265_s20 }
  0x2e   :  { %p272_p8 = por %p271_p7, %p270_p6 }
  0x30   :  { %p273_p9 = pnand %p272_p8, %p266_p5 }
  0x32   :  { %276 = shalt.err (!%p273_p9)
}
  0x33   :  { %44 = dma.hbm_to_vmem [thread:$0]  %s403_s2, 16, %s42_s11, [#allocation7]  }
  0x34   :  { %299 = dma.done.wait [#allocation4], 128  }
  0x35   :  { %300 = vsyncadd [#allocation4], 4294967168 }
  0x36   :  { %301 = dma.done.wait [#allocation7], 272  }
  0x37   :  { %302 = vsyncadd [#allocation7], 4294967024  ;;  %vm59_vm0 = vcmask 523264   ;;  %v310_v0 = vmov 0.0   ;;  %vm311_vm1 = vmmov 0   ;;  %v208_v1 = vld [vmem:[#allocation6] sm:$0xff]  }
  0x38   :  { %60 = vst.msk [vmem:[#allocation2] sm:$0xff] %vm59_vm0, %v310_v0  ;;  %61 = vst.msk [vmem:[#allocation2 + $0x8] sm:$0xff] %vm59_vm0, %v310_v0  ;;  %192 = vmatprep.subr.bf16.mxu0 %v310_v0  ;;  %196 = vmatprep.mubr.msk.bf16.mxu0 %vm311_vm1, %v310_v0  ;;  %v209_v2 = vld [vmem:[#allocation6 + $0x8] sm:$0xff]   ;;  %v210_v3 = vld [vmem:[#allocation3] sm:$0xff]   ;;  %vm87_vm2 = vcmask 261120   ;;  %vm159_vm3 = vcmask 519168  }
  0x39   :  { %193 = vmatpush3.bf16.msra.mxu0 %v208_v1  ;;  %v184_v12 = vld [vmem:[#allocation8] ss:$0 sm:$0xff]  ;;  %s312_s2 = smov [#allocation9]  }
  0x3a   :  { %194 = vmatprep.subr.bf16.mxu0 %v310_v0  ;;  %s167_s22 = sshll.u32 %s312_s2, 4  ;;  %s168_s22 = int_to_ptr.vmem [resolvable:$true] %s167_s22 }
  0x3b   :  { %s277_s23 = scalar_lea.vmem %s168_s22, 128  ;;  %p282_p11 = scmp.lt.s32.totalorder %s168_s22, %s168_s22 }
  0x3c   :  { %p278_p10 = scmp.ne.s32.totalorder %s168_s22, %s277_s23  ;;  %p283_p12 = scmp.lt.s32.totalorder %s277_s23, %s277_s23 }
  0x3d   :  { %195 = vmatpush3.bf16.msra.mxu0 %v209_v2 }
  0x3e   :  { %p284_p13 = por %p283_p12, %p282_p11 }
  0x3f   :  { %v62_v4 = vld [vmem:[#allocation2] sm:$0xff]  ;;  %v63_v6 = vld [vmem:[#allocation2 + $0x8] sm:$0xff] }
  0x40   :  { %197 = vmatmul.mubr.msk.bf16.vlgmr.msra.gmra.mrb[0].mxu0 %vm87_vm2, %v210_v3  ;;  %p285_p0 = pnand %p284_p13, %p278_p10 }
 0x113   :  { %v125_v5 = vpop.f32.mrb[0].mxu0 }
 0x114   :  { %v132_v7 = vadd.f32 %v125_v5, %v62_v4  ;;  %v198_v8 = vpop.f32.mrb[1].mxu0 }
 0x115   :  { %v128_v9 = vpop.f32.mrb[2].mxu0 }
 0x116   :  { %135 = vst.msk [vmem:[#allocation2] sm:$0xff] %vm59_vm0, %v132_v7  ;;  %v133_v10 = vadd.f32 %v128_v9, %v63_v6  ;;  %v199_v11 = vpop.f32.mrb[3].mxu0 }
 0x118   :  { %136 = vst.msk [vmem:[#allocation2 + $0x8] sm:$0xff] %vm59_vm0, %v133_v10 }
 0x11d   :  { %v140_v13 = vld [vmem:[#allocation2] sm:$0xff] }
 0x11e   :  { %v149_v14 = vadd.f32 %v184_v12, %v140_v13 }
 0x11f   :  { %v141_v15 = vld [vmem:[#allocation2 + $0x8] sm:$0xff] }
 0x120   :  { %v150_v16 = vadd.f32 %v184_v12, %v141_v15  ;;  %v187_v17 = vpack.c.bf16 %v149_v14, %v149_v14 }
 0x122   :  { %v188_v18 = vpack.c.bf16 %v150_v16, %v150_v16  ;;  %160 = vst.msk [vmem:[#allocation9] sm:$0xf] %vm159_vm3, %v187_v17 }
 0x124   :  { %161 = vst.msk [vmem:[#allocation9 + $0x4] sm:$0xf] %vm159_vm3, %v188_v18 }
 0x125   :  { %288 = shalt.err (!%p285_p0)
}
 0x126   :  { %s289_s28 = scalar_lea.hbm %s404_s3, 128 }
 0x127   :  { %p290_p1 = scmp.ne.s32.totalorder %s404_s3, %s289_s28  ;;  %p293_p2 = scmp.lt.u32.totalorder %s289_s28, %s404_s3 }
 0x129   :  { %p295_p3 = pnand %p293_p2, %p290_p1 }
 0x12b   :  { %298 = shalt.err (!%p295_p3)
}
 0x12c   :  { %173 = dma.vmem_to_hbm [thread:$0]  %s168_s22, 128, %s404_s3, [#allocation5], %s307_s24, %s307_s24, %s308_s25  }
 0x12d   :  { %303 = dma.done.wait [#allocation5], 128  }
 0x12e   :  { %304 = vsyncadd [#allocation5], 4294967168 }
 0x12f   :  { %177 = vsyncpa [#allocation4], 1 }
 0x130   :  { %178 = vsyncpa [#allocation7], 1 }
 0x131   :  { %179 = vsyncpa [#allocation5], 1 }

// kernel: transformer_decoder_forward.22
= control target key start
LH: loop header
LB: loop body
LE: loop exit
PB: predicated region body
PF: predicated region fallthrough
CT: control target
= control target key end

     0   :  { %11 = vsyncpa [#allocation4], 0  ;;  %s644_s0 = inlined_call_operand.hbm [shape: bf16[16,32], index: 0, kind: input, shape index: {}]   ;;  %s645_s1 = inlined_call_operand.hbm [shape: bf16[32,32], index: 1, kind: input, shape index: {}]   ;;  %s646_s2 = inlined_call_operand.hbm [shape: f32[1,32], index: 2, kind: input, shape index: {}]   ;;  %s647_s3 = inlined_call_operand.hbm [shape: bf16[16,32], index: 3, kind: input, shape index: {}]   ;;  %s648_s4 = inlined_call_operand.hbm [shape: f32[1,32], index: 4, kind: input, shape index: {}]   ;;  %s649_s5 = inlined_call_operand.hbm [shape: f32[1,32], index: 5, kind: input, shape index: {}]   ;;  %s650_s6 = inlined_call_operand.hbm [shape: bf16[16,32], index: 6, kind: output, shape index: {}]  }
   0x1   :  { %12 = vsyncpa [#allocation7], 0 }
   0x2   :  { %13 = vsyncpa [#allocation10], 0 }
   0x3   :  { %14 = vsyncpa [#allocation13], 0 }
   0x4   :  { %15 = vsyncpa [#allocation5], 0  ;;  %s486_s21 = smov [#allocation6]   ;;  %s487_s23 = smov [#allocation9]  }
   0x5   :  { %s33_s22 = sshll.u32 %s486_s21, 4  ;;  %s55_s24 = sshll.u32 %s487_s23, 4  ;;  %s34_s22 = int_to_ptr.vmem [resolvable:$true] %s33_s22  ;;  %s532_s24 = int_to_ptr.vmem [resolvable:$true] %s55_s24 }
   0x6   :  { %s322_s27 = scalar_lea.hbm %s645_s1, 256 }
   0x7   :  { %p323_p0 = scmp.ne.s32.totalorder %s645_s1, %s322_s27  ;;  %p326_p1 = scmp.lt.u32.totalorder %s322_s27, %s645_s1 }
   0x9   :  { %p328_p2 = pnand %p326_p1, %p323_p0 }
   0xb   :  { %331 = shalt.err (!%p328_p2)
}
   0xc   :  { %s332_s8 = scalar_lea.vmem %s34_s22, 256  ;;  %p337_p4 = scmp.lt.s32.totalorder %s34_s22, %s34_s22 }
   0xd   :  { %p333_p3 = scmp.ne.s32.totalorder %s34_s22, %s332_s8  ;;  %p338_p5 = scmp.lt.s32.totalorder %s332_s8, %s332_s8 }
   0xf   :  { %p339_p6 = por %p338_p5, %p337_p4 }
  0x11   :  { %p340_p7 = pnand %p339_p6, %p333_p3 }
  0x13   :  { %343 = shalt.err (!%p340_p7)
}
  0x14   :  { %s488_s9 = smov 64   ;;  %s489_s10 = smov 4  }
  0x15   :  { %39 = dma.hbm_to_vmem [thread:$0]  %s645_s1, 256, %s34_s22, [#allocation7], %s488_s9, %s488_s9, %s489_s10  }
  0x16   :  { %s344_s15 = scalar_lea.hbm %s647_s3, 128 }
  0x17   :  { %p345_p8 = scmp.ne.s32.totalorder %s647_s3, %s344_s15  ;;  %p348_p9 = scmp.lt.u32.totalorder %s344_s15, %s647_s3 }
  0x19   :  { %p350_p10 = pnand %p348_p9, %p345_p8 }
  0x1b   :  { %353 = shalt.err (!%p350_p10)
}
  0x1c   :  { %s354_s20 = scalar_lea.vmem %s532_s24, 128  ;;  %p359_p12 = scmp.lt.s32.totalorder %s532_s24, %s532_s24 }
  0x1d   :  { %p355_p11 = scmp.ne.s32.totalorder %s532_s24, %s354_s20  ;;  %p360_p13 = scmp.lt.s32.totalorder %s354_s20, %s354_s20 }
  0x1f   :  { %p361_p0 = por %p360_p13, %p359_p12 }
  0x21   :  { %p362_p1 = pnand %p361_p0, %p355_p11 }
  0x23   :  { %365 = shalt.err (!%p362_p1)
}
  0x24   :  { %61 = dma.hbm_to_vmem [thread:$0]  %s647_s3, 128, %s532_s24, [#allocation10], %s488_s9, %s488_s9, %s489_s10  }
  0x25   :  { %s490_s22 = smov [#allocation3]   ;;  %s491_s25 = smov [#allocation8]  }
  0x26   :  { %s21_s23 = sshll.u32 %s490_s22, 4  ;;  %s46_s26 = sshll.u32 %s491_s25, 4  ;;  %s22_s23 = int_to_ptr.vmem [resolvable:$true] %s21_s23  ;;  %s47_s26 = int_to_ptr.vmem [resolvable:$true] %s46_s26 }
  0x27   :  { %s366_s29 = scalar_lea.hbm %s644_s0, 128 }
  0x28   :  { %p367_p2 = scmp.ne.s32.totalorder %s644_s0, %s366_s29  ;;  %p370_p3 = scmp.lt.u32.totalorder %s366_s29, %s644_s0 }
  0x2a   :  { %p372_p4 = pnand %p370_p3, %p367_p2 }
  0x2c   :  { %375 = shalt.err (!%p372_p4)
}
  0x2d   :  { %s376_s3 = scalar_lea.vmem %s22_s23, 128  ;;  %p381_p6 = scmp.lt.s32.totalorder %s22_s23, %s22_s23 }
  0x2e   :  { %p377_p5 = scmp.ne.s32.totalorder %s22_s23, %s376_s3  ;;  %p382_p7 = scmp.lt.s32.totalorder %s376_s3, %s376_s3 }
  0x30   :  { %p383_p8 = por %p382_p7, %p381_p6 }
  0x32   :  { %p384_p9 = pnand %p383_p8, %p377_p5 }
  0x34   :  { %387 = shalt.err (!%p384_p9)
}
  0x35   :  { %27 = dma.hbm_to_vmem [thread:$0]  %s644_s0, 128, %s22_s23, [#allocation4], %s488_s9, %s488_s9, %s489_s10  }
  0x36   :  { %s388_s15 = scalar_lea.hbm %s646_s2, 16 }
  0x37   :  { %p389_p10 = scmp.ne.s32.totalorder %s646_s2, %s388_s15  ;;  %p392_p11 = scmp.lt.u32.totalorder %s388_s15, %s646_s2 }
  0x39   :  { %p394_p12 = pnand %p392_p11, %p389_p10 }
  0x3b   :  { %397 = shalt.err (!%p394_p12)
}
  0x3c   :  { %s398_s20 = scalar_lea.vmem %s47_s26, 16  ;;  %s402_s1 = scalar_lea.vmem %s47_s26, 32 }
  0x3d   :  { %p399_p13 = scmp.ne.s32.totalorder %s47_s26, %s398_s20  ;;  %p403_p0 = scmp.lt.s32.totalorder %s47_s26, %s47_s26 }
  0x3e   :  { %p404_p1 = scmp.lt.s32.totalorder %s402_s1, %s398_s20 }
  0x40   :  { %p405_p2 = por %p404_p1, %p403_p0 }
  0x42   :  { %p406_p3 = pnand %p405_p2, %p399_p13 }
  0x44   :  { %409 = shalt.err (!%p406_p3)
}
  0x45   :  { %49 = dma.hbm_to_vmem [thread:$0]  %s646_s2, 16, %s47_s26, [#allocation7]  }
  0x46   :  { %s492_s22 = smov [#allocation11]   ;;  %s493_s25 = smov [#allocation12]  }
  0x47   :  { %s68_s23 = sshll.u32 %s492_s22, 4  ;;  %s78_s27 = sshll.u32 %s493_s25, 4  ;;  %s69_s23 = int_to_ptr.vmem [resolvable:$true] %s68_s23  ;;  %s79_s27 = int_to_ptr.vmem [resolvable:$true] %s78_s27 }
  0x48   :  { %s410_s30 = scalar_lea.hbm %s648_s4, 16 }
  0x49   :  { %p411_p4 = scmp.ne.s32.totalorder %s648_s4, %s410_s30  ;;  %p414_p5 = scmp.lt.u32.totalorder %s410_s30, %s648_s4 }
  0x4b   :  { %p416_p6 = pnand %p414_p5, %p411_p4 }
  0x4d   :  { %419 = shalt.err (!%p416_p6)
}
  0x4e   :  { %s420_s2 = scalar_lea.vmem %s69_s23, 16  ;;  %s424_s26 = scalar_lea.vmem %s69_s23, 32 }
  0x4f   :  { %p421_p7 = scmp.ne.s32.totalorder %s69_s23, %s420_s2  ;;  %p425_p8 = scmp.lt.s32.totalorder %s69_s23, %s69_s23 }
  0x50   :  { %p426_p9 = scmp.lt.s32.totalorder %s424_s26, %s420_s2 }
  0x52   :  { %p427_p10 = por %p426_p9, %p425_p8 }
  0x54   :  { %p428_p11 = pnand %p427_p10, %p421_p7 }
  0x56   :  { %431 = shalt.err (!%p428_p11)
}
  0x57   :  { %71 = dma.hbm_to_vmem [thread:$0]  %s648_s4, 16, %s69_s23, [#allocation10]  }
  0x58   :  { %s432_s15 = scalar_lea.hbm %s649_s5, 16 }
  0x59   :  { %p433_p12 = scmp.ne.s32.totalorder %s649_s5, %s432_s15  ;;  %p436_p13 = scmp.lt.u32.totalorder %s432_s15, %s649_s5 }
  0x5b   :  { %p438_p0 = pnand %p436_p13, %p433_p12 }
  0x5d   :  { %441 = shalt.err (!%p438_p0)
}
  0x5e   :  { %s442_s20 = scalar_lea.vmem %s79_s27, 16  ;;  %s446_s1 = scalar_lea.vmem %s79_s27, 32 }
  0x5f   :  { %p443_p1 = scmp.ne.s32.totalorder %s79_s27, %s442_s20  ;;  %p447_p2 = scmp.lt.s32.totalorder %s79_s27, %s79_s27 }
  0x60   :  { %p448_p3 = scmp.lt.s32.totalorder %s446_s1, %s442_s20 }
  0x62   :  { %p449_p4 = por %p448_p3, %p447_p2 }
  0x64   :  { %p450_p5 = pnand %p449_p4, %p443_p1 }
  0x66   :  { %453 = shalt.err (!%p450_p5)
}
  0x67   :  { %81 = dma.hbm_to_vmem [thread:$0]  %s649_s5, 16, %s79_s27, [#allocation13]  }
  0x68   :  { %476 = dma.done.wait [#allocation4], 128  }
  0x69   :  { %477 = vsyncadd [#allocation4], 4294967168 }
  0x6a   :  { %478 = dma.done.wait [#allocation7], 272  }
  0x6b   :  { %479 = vsyncadd [#allocation7], 4294967024 }
  0x6c   :  { %480 = dma.done.wait [#allocation10], 144  }
  0x6d   :  { %481 = vsyncadd [#allocation10], 4294967152 }
  0x6e   :  { %482 = dma.done.wait [#allocation13], 16  }
  0x6f   :  { %483 = vsyncadd [#allocation13], 4294967280  ;;  %vm105_vm0 = vcmask 261120   ;;  %v494_v0 = vmov 0.0   ;;  %vm495_vm1 = vmmov 0   ;;  %v315_v1 = vld [vmem:[#allocation6] sm:$0xff]  }
  0x70   :  { %106 = vst.msk [vmem:[#allocation2] sm:$0xff] %vm105_vm0, %v494_v0  ;;  %107 = vst.msk [vmem:[#allocation2 + $0x8] sm:$0xff] %vm105_vm0, %v494_v0  ;;  %296 = vmatprep.subr.bf16.mxu0 %v494_v0  ;;  %300 = vmatprep.mubr.msk.bf16.mxu0 %vm495_vm1, %v494_v0  ;;  %v316_v2 = vld [vmem:[#allocation6 + $0x8] sm:$0xff]   ;;  %v317_v3 = vld [vmem:[#allocation3] sm:$0xff]   ;;  %vm255_vm2 = vcmask 257024   ;;  %s496_s5 = smov [#allocation14]  }
  0x71   :  { %297 = vmatpush3.bf16.msra.mxu0 %v315_v1  ;;  %v290_v12 = vld [vmem:[#allocation9] sm:$0xff]   ;;  %v282_v13 = vld [vmem:[#allocation8] ss:$0 sm:$0xff]  ;;  %v283_v41 = vld [vmem:[#allocation11] ss:$0 sm:$0xff]  ;;  %s263_s21 = sshll.u32 %s496_s5, 4  ;;  %s264_s21 = int_to_ptr.vmem [resolvable:$true] %s263_s21 }
  0x72   :  { %298 = vmatprep.subr.bf16.mxu0 %v494_v0  ;;  %v291_v14 = vunpack.c.l.bf16 %v290_v12  ;;  %v292_v17 = vunpack.c.h.bf16 %v290_v12  ;;  %v284_v43 = vld [vmem:[#allocation12] ss:$0 sm:$0xff]  ;;  %s454_s22 = scalar_lea.vmem %s264_s21, 128  ;;  %p459_p7 = scmp.lt.s32.totalorder %s264_s21, %s264_s21 }
  0x73   :  { %p455_p6 = scmp.ne.s32.totalorder %s264_s21, %s454_s22  ;;  %p460_p8 = scmp.lt.s32.totalorder %s454_s22, %s454_s22 }
  0x75   :  { %299 = vmatpush3.bf16.msra.mxu0 %v316_v2  ;;  %p461_p9 = por %p460_p8, %p459_p7 }
  0x77   :  { %v108_v4 = vld [vmem:[#allocation2] sm:$0xff]  ;;  %v109_v6 = vld [vmem:[#allocation2 + $0x8] sm:$0xff]  ;;  %p462_p10 = pnand %p461_p9, %p455_p6 }
  0x78   :  { %301 = vmatmul.mubr.msk.bf16.vlgmr.msra.gmra.mrb[0].mxu0 %vm105_vm0, %v317_v3 }
 0x14b   :  { %v171_v5 = vpop.f32.mrb[0].mxu0 }
 0x14c   :  { %v178_v7 = vadd.f32 %v171_v5, %v108_v4  ;;  %v302_v8 = vpop.f32.mrb[1].mxu0 }
 0x14d   :  { %v174_v9 = vpop.f32.mrb[2].mxu0 }
 0x14e   :  { %180 = vst.msk [vmem:[#allocation2] sm:$0xff] %vm105_vm0, %v178_v7  ;;  %v179_v10 = vadd.f32 %v174_v9, %v109_v6  ;;  %v303_v11 = vpop.f32.mrb[3].mxu0 }
 0x150   :  { %181 = vst.msk [vmem:[#allocation2 + $0x8] sm:$0xff] %vm105_vm0, %v179_v10 }
 0x155   :  { %v185_v15 = vld [vmem:[#allocation2] sm:$0xff] }
 0x156   :  { %v194_v16 = vadd.f32 %v282_v13, %v185_v15 }
 0x157   :  { %v186_v18 = vld [vmem:[#allocation2 + $0x8] sm:$0xff] }
 0x158   :  { %v200_v19 = vadd.f32 %v291_v14, %v194_v16  ;;  %v195_v20 = vadd.f32 %v282_v13, %v186_v18 }
 0x15a   :  { %v202_v21 = vsel %vm105_vm0, %v200_v19, 0.0  ;;  %v201_v22 = vadd.f32 %v292_v17, %v195_v20 }
 0x15b   :  { %203 = vadd.xlane.f32.xlu0 %v202_v21 }
 0x15c   :  { %v205_v23 = vsel %vm105_vm0, %v201_v22, 0.0 }
 0x15f   :  { %206 = vadd.xlane.f32.xlu0 %v205_v23 }
 0x1e8   :  { %v204_v24 = vpop.xlane.xlu0 %203 }
 0x1e9   :  { %v209_v25 = vmul.f32 0.03125, %v204_v24 }
 0x1eb   :  { %v211_v26 = vsub.f32 %v200_v19, %v209_v25 }
 0x1ec   :  { %v207_v27 = vpop.xlane.xlu0 %206 }
 0x1ed   :  { %v210_v28 = vmul.f32 0.03125, %v207_v27  ;;  %v213_v29 = vmul.f32 %v211_v26, %v211_v26 }
 0x1ef   :  { %v212_v30 = vsub.f32 %v201_v22, %v210_v28  ;;  %v215_v31 = vsel %vm105_vm0, %v213_v29, 0.0 }
 0x1f0   :  { %216 = vadd.xlane.f32.xlu1 %v215_v31 }
 0x1f1   :  { %v214_v32 = vmul.f32 %v212_v30, %v212_v30 }
 0x1f3   :  { %v218_v33 = vsel %vm105_vm0, %v214_v32, 0.0 }
 0x1f4   :  { %219 = vadd.xlane.f32.xlu1 %v218_v33 }
 0x27d   :  { %v217_v34 = vpop.xlane.xlu1 %216 }
 0x27e   :  { %v221_v35 = vmul.f32 0.03125, %v217_v34 }
 0x280   :  { %v223_v36 = vadd.f32 1e-05, %v221_v35 }
 0x281   :  { %v220_v37 = vpop.xlane.xlu1 %219 }
 0x282   :  { %318 = vrsqrt.f32 %v223_v36  ;;  %v222_v38 = vmul.f32 0.03125, %v220_v37 }
 0x284   :  { %v224_v39 = vadd.f32 1e-05, %v222_v38 }
 0x286   :  { %320 = vrsqrt.f32 %v224_v39 }
 0x28c   :  { %v319_v40 = vpop.eup %318 }
 0x28d   :  { %v227_v42 = vmul.f32 %v319_v40, %v211_v26 }
 0x28f   :  { %v236_v44 = vmul.f32 %v283_v41, %v227_v42 }
 0x290   :  { %v321_v45 = vpop.eup %320 }
 0x291   :  { %v228_v46 = vmul.f32 %v321_v45, %v212_v30  ;;  %v245_v47 = vadd.f32 %v284_v43, %v236_v44 }
 0x293   :  { %v237_v48 = vmul.f32 %v283_v41, %v228_v46  ;;  %v287_v49 = vpack.c.bf16 %v245_v47, %v245_v47 }
 0x295   :  { %v246_v50 = vadd.f32 %v284_v43, %v237_v48  ;;  %256 = vst.msk [vmem:[#allocation14] sm:$0xf] %vm255_vm2, %v287_v49 }
 0x297   :  { %v288_v51 = vpack.c.bf16 %v246_v50, %v246_v50 }
 0x299   :  { %257 = vst.msk [vmem:[#allocation14 + $0x4] sm:$0xf] %vm255_vm2, %v288_v51 }
 0x29a   :  { %465 = shalt.err (!%p462_p10)
}
 0x29b   :  { %s466_s27 = scalar_lea.hbm %s650_s6, 128 }
 0x29c   :  { %p467_p11 = scmp.ne.s32.totalorder %s650_s6, %s466_s27  ;;  %p470_p12 = scmp.lt.u32.totalorder %s466_s27, %s650_s6 }
 0x29e   :  { %p472_p13 = pnand %p470_p12, %p467_p11 }
 0x2a0   :  { %475 = shalt.err (!%p472_p13)
}
 0x2a1   :  { %269 = dma.vmem_to_hbm [thread:$0]  %s264_s21, 128, %s650_s6, [#allocation5], %s488_s9, %s488_s9, %s489_s10  }
 0x2a2   :  { %484 = dma.done.wait [#allocation5], 128  }
 0x2a3   :  { %485 = vsyncadd [#allocation5], 4294967168 }
 0x2a4   :  { %273 = vsyncpa [#allocation4], 1 }
 0x2a5   :  { %274 = vsyncpa [#allocation7], 1 }
 0x2a6   :  { %275 = vsyncpa [#allocation10], 1 }
 0x2a7   :  { %276 = vsyncpa [#allocation13], 1 }
 0x2a8   :  { %277 = vsyncpa [#allocation5], 1 }

// kernel: transformer_decoder_forward.21
= control target key start
LH: loop header
LB: loop body
LE: loop exit
PB: predicated region body
PF: predicated region fallthrough
CT: control target
= control target key end

     0   :  { %s1593_s0 = inlined_call_operand.hbm [shape: bf16[2,8,32], index: 0, kind: input, shape index: {}]   ;;  %s1594_s1 = inlined_call_operand.hbm [shape: bf16[2,8,64], index: 1, kind: input, shape index: {}]   ;;  %s1595_s2 = inlined_call_operand.hbm [shape: f32[8,8], index: 2, kind: input, shape index: {}]   ;;  %s1596_s3 = inlined_call_operand.hbm [shape: bf16[2,8,32], index: 3, kind: output, shape index: {}]  }
   0x1   :  { %1602 = sst [smem:[#allocation14_spill]] %s1595_s2 }
   0x2   :  { %8 = vsyncpa [#allocation3], 0 }
   0x3   :  { %10 = vsyncpa [#allocation3 + $0x1], 0 }
   0x4   :  { %11 = vsyncpa [#allocation6], 0 }
   0x5   :  { %13 = vsyncpa [#allocation6 + $0x1], 0 }
   0x6   :  { %14 = vsyncpa [#allocation4], 0 }
   0x7   :  { %16 = vsyncpa [#allocation4 + $0x1], 0  ;;  %s1273_s12 = smov 0   ;;  %s1275_s13 = smov 0  }
   0x8   :  { %s1277_s14 = smov 0   ;;  %s1279_s15 = smov 0  }
   0x9   :  { %s1281_s16 = smov 0   ;;  %s1283_s17 = smov 0  }
   0xa LB: > { %s1304_s18 = sadd.s32 4294967295, %s1235_s17   ;;  %s859_s19 = sadd.s32 4294967294, %s1235_s17   ;;  %s1235_s17 = sphi %s1283_s17, %s22_s17   ;;  %s1231_s16 = sphi %s1281_s16, %s1626_s16   ;;  %s1227_s15 = sphi %s1279_s15, %s1625_s15   ;;  %s1223_s14 = sphi %s1277_s14, %s1624_s14   ;;  %s1219_s13 = sphi %s1275_s13, %s1623_s13   ;;  %s1215_s12 = sphi %s1273_s12, %s1622_s12  }
   0xb   : > { %p56_p0 = scmp.ne.s32.totalorder %s1219_s13, %s1215_s12  ;;  %p1597_p1 = scmp.eq.s32.totalorder %s1304_s18, 0 }
   0xc   : > { %p140_p3 = scmp.eq.s32.totalorder %s859_s19, 1  ;;  %p860_p5 = scmp.ge.s32.totalorder %s1235_s17, 1 }
   0xd   : > { %p1313_p4 = por %p1597_p1, %p56_p0  ;;  %p147_p7 = scmp.lt.s32.totalorder %s1235_s17, 3 }
   0xe   : > { %p1318_p6 = por %p140_p3, %p56_p0  ;;  %s1237_s23 = smov [#allocation7]  }
   0xf   : > { %s1603_s20 = scalar_select %p1313_p4, 1, 0 }
  0x10   : > { %s1604_s21 = scalar_select %p1318_p6, 1, 0 }
  0x11   : > { %p1323_p8 = pnand %p860_p5, %p147_p7  ;;  %s162_s24 = sshll.u32 %s1237_s23, 4  ;;  %s163_s24 = int_to_ptr.vmem [resolvable:$true] %s162_s24 }
  0x12   : > { %s34_s26 = sadd.s32 1, %s1231_s16  ;;  %s43_s27 = sadd.s32 1, %s1223_s14 }
  0x13   : > { %s1605_s22 = scalar_select %p1323_p8, 1, 0 }
  0x14   : > { %p960_p10 = pneg %p1323_p8  ;;  %p1338_p12 = scmp.ge.s32.totalorder %s34_s26, 2 }
  0x15   : > { %s1608_s2 = sld [smem:[#allocation14_spill]] }
  0x16   : > { %p1332_p11 = pnand %p960_p10, %p1597_p1 }
  0x17   : > { %s1607_s28 = scalar_select %p1338_p12, 1, 0 }
  0x18   : > { %p1059_p0 = pneg %p1332_p11 }
  0x1b   : > { %s1057_s4 = scalar_lea.hbm %s1608_s2, 128 }
  0x1c   : > { %p1058_p13 = scmp.ne.s32.totalorder %s1608_s2, %s1057_s4  ;;  %p1064_p7 = scmp.lt.u32.totalorder %s1057_s4, %s1608_s2 }
  0x1e   : > { %p1060_p3 = pnand %p1059_p0, %p1058_p13 }
  0x20   : > { %p1061_p5 = pneg %p1060_p3 }
  0x22   : > { %p1066_p10 = pnand %p1064_p7, %p1061_p5 }
  0x24   : > { %1069 = shalt.err (!%p1066_p10)
}
  0x25   : > { %s1070_s9 = scalar_lea.vmem %s163_s24, 128  ;;  %p1078_p6 = scmp.lt.s32.totalorder %s163_s24, %s163_s24 }
  0x26   : > { %p1071_p9 = scmp.ne.s32.totalorder %s163_s24, %s1070_s9  ;;  %p1079_p4 = scmp.lt.s32.totalorder %s1070_s9, %s1070_s9 }
  0x28   : > { %p1073_p1 = pnand %p1071_p9, %p1059_p0  ;;  %p1080_p8 = por %p1079_p4, %p1078_p6 }
  0x2a   : > { %p1074_p2 = pneg %p1073_p1 }
  0x2c   : > { %p1081_p12 = pnand %p1080_p8, %p1074_p2 }
  0x2e   : > { %1084 = shalt.err (!%p1081_p12)
}
  0x2f   : > { %963 = dma.hbm_to_vmem [thread:$0]  (!%p1332_p11), %s1608_s2, 128, %s163_s24, [#allocation6]  }
  0x30   : > { %p1609_p1 = scmp.ne.s32.totalorder %s1607_s28, 0  ;;  %p50_p2 = scmp.ne.s32.totalorder %s1223_s14, %s1219_s13 }
  0x31   : > { %p51_p4 = scmp.eq.s32.totalorder %s1235_s17, 0  ;;  %p976_p6 = scmp.lt.s32.totalorder %s1235_s17, 2 }
  0x32   : > { %s1628_s26 = smov (%p1609_p1, %s34_s26), 0  ;;  %p1611_p12 = scmp.eq.s32.totalorder %s1304_s18, 1 }
  0x33   : > { %1610 = sst [smem:[#allocation13_spill]] %s1628_s26  ;;  %s38_s19 = ssub.s32 %s1231_s16, %s1628_s26 }
  0x34   : > { %p41_p8 = scmp.eq.s32.totalorder %s38_s19, 0  ;;  %p52_p9 = por %p51_p4, %p50_p2 }
  0x35   : > { %p1370_p13 = por %p1611_p12, %p50_p2  ;;  %s173_s25 = sand.u32 1, %s1223_s14  }
  0x36   : > { %s1378_s29 = scalar_select %p41_p8, %s1223_s14, %s43_s27  }
  0x37   : > { %s1612_s23 = scalar_select %p1370_p13, 1, 0 }
  0x38   : > { %s1380_s24 = sshll.u32 %s173_s25, 2  ;;  %s864_s28 = sshll.u32 %s1231_s16, 6 }
  0x39   : > { %s1386_s5 = scalar_lea.hbm %s1593_s0, %s864_s28  ;;  %s177_s6 = scalar_lea.vmem [#allocation2], %s1380_s24 }
  0x3a   : > { %s185_s7 = sshll.u32 %s177_s6, 4  ;;  %p1391_p11 = pnand %p976_p6, %p52_p9  ;;  %s1389_s7 = int_to_ptr.vmem [resolvable:$true] %s185_s7 }
  0x3b   : > { %s1398_s10 = scalar_lea.hbm %s1594_s1, %s864_s28  ;;  %s192_s11 = sand.u32 1, %s1235_s17  }
  0x3c   : > { %s174_s19 = scalar_lea.sflag [#allocation3], %s173_s25  ;;  %s1085_s30 = scalar_lea.hbm %s1386_s5, 64 }
  0x3d   : > { %p1086_p0 = scmp.ne.s32.totalorder %s1386_s5, %s1085_s30  ;;  %p1087_p3 = pneg %p1391_p11 }
  0x3e   : > { %s1090_s2 = scalar_lea.hbm %s1593_s0, 128  ;;  %p1091_p10 = scmp.lt.u32.totalorder %s1386_s5, %s1593_s0 }
  0x3f   : > { %p1088_p5 = pnand %p1087_p3, %p1086_p0  ;;  %p1092_p1 = scmp.lt.u32.totalorder %s1090_s2, %s1085_s30 }
  0x40   : > { %p1094_p4 = scmp.lt.u32.totalorder %s1085_s30, %s1386_s5 }
  0x41   : > { %p1089_p7 = pneg %p1088_p5  ;;  %p1093_p2 = por %p1092_p1, %p1091_p10 }
  0x43   : > { %p1095_p6 = por %p1094_p4, %p1093_p2 }
  0x45   : > { %p1096_p8 = pnand %p1095_p6, %p1089_p7 }
  0x47   : > { %1099 = shalt.err (!%p1096_p8)
}
  0x48   : > { %s1100_s25 = scalar_lea.vmem %s1389_s7, 64  ;;  %s1238_s28 = smov [#allocation2]  }
  0x49   : > { %p1101_p9 = scmp.ne.s32.totalorder %s1389_s7, %s1100_s25  ;;  %s1105_s9 = sshll.u32 %s1238_s28, 4  ;;  %s1106_s9 = int_to_ptr.vmem [resolvable:$false] %s1105_s9 }
  0x4a   : > { %s1107_s26 = scalar_lea.vmem %s1106_s9, 128  ;;  %p1108_p5 = scmp.lt.s32.totalorder %s1389_s7, %s1106_s9 }
  0x4b   : > { %p1103_p12 = pnand %p1101_p9, %p1087_p3  ;;  %p1109_p10 = scmp.lt.s32.totalorder %s1107_s26, %s1100_s25 }
  0x4d   : > { %p1104_p0 = pneg %p1103_p12  ;;  %p1110_p1 = por %p1109_p10, %p1108_p5 }
  0x4f   : > { %p1111_p2 = pnand %p1110_p1, %p1104_p0 }
  0x51   : > { %1114 = shalt.err (!%p1111_p2)
}
  0x52   : > { %967 = dma.hbm_to_vmem [thread:$0]  (!%p1391_p11), %s1386_s5, 64, %s1389_s7, %s174_s19  }
  0x53   : > { %s196_s2 = scalar_lea.vmem [#allocation5], %s1380_s24  ;;  %s193_s4 = scalar_lea.sflag [#allocation6], %s192_s11 }
  0x54   : > { %s203_s30 = sshll.u32 %s196_s2, 4  ;;  %s1115_s6 = scalar_lea.hbm %s1398_s10, 64  ;;  %s204_s30 = int_to_ptr.vmem [resolvable:$true] %s203_s30 }
  0x55   : > { %p1116_p7 = scmp.ne.s32.totalorder %s1398_s10, %s1115_s6  ;;  %s1120_s28 = scalar_lea.hbm %s1594_s1, 128 }
  0x56   : > { %p1121_p8 = scmp.lt.u32.totalorder %s1398_s10, %s1594_s1  ;;  %p1122_p9 = scmp.lt.u32.totalorder %s1120_s28, %s1115_s6 }
  0x57   : > { %p1118_p4 = pnand %p1116_p7, %p1087_p3  ;;  %p1124_p0 = scmp.lt.u32.totalorder %s1115_s6, %s1398_s10 }
  0x58   : > { %p1123_p12 = por %p1122_p9, %p1121_p8 }
  0x59   : > { %p1119_p6 = pneg %p1118_p4 }
  0x5a   : > { %p1125_p5 = por %p1124_p0, %p1123_p12 }
  0x5c   : > { %p1126_p10 = pnand %p1125_p5, %p1119_p6 }
  0x5e   : > { %1129 = shalt.err (!%p1126_p10)
}
  0x5f   : > { %s1130_s24 = scalar_lea.vmem %s204_s30, 64  ;;  %s1239_s5 = smov [#allocation5]  }
  0x60   : > { %p1131_p1 = scmp.ne.s32.totalorder %s204_s30, %s1130_s24  ;;  %s1135_s7 = sshll.u32 %s1239_s5, 4  ;;  %s1136_s7 = int_to_ptr.vmem [resolvable:$false] %s1135_s7 }
  0x61   : > { %s1137_s11 = scalar_lea.vmem %s1136_s7, 128  ;;  %p1138_p4 = scmp.lt.s32.totalorder %s204_s30, %s1136_s7 }
  0x62   : > { %p1133_p2 = pnand %p1131_p1, %p1087_p3  ;;  %p1139_p13 = scmp.lt.s32.totalorder %s1137_s11, %s1130_s24 }
  0x64   : > { %p1134_p7 = pneg %p1133_p2  ;;  %p1140_p8 = por %p1139_p13, %p1138_p4 }
  0x66   : > { %p1141_p9 = pnand %p1140_p8, %p1134_p7 }
  0x68   : > { %1144 = shalt.err (!%p1141_p9)
}
  0x69   : > { %970 = dma.hbm_to_vmem [thread:$0]  (!%p1391_p11), %s1398_s10, 64, %s204_s30, %s193_s4  }
  0x6a   : > { %p1614_p6 = scmp.ne.s32.totalorder %s1605_s22, 0 }
  0x6b   : > { %s1451_s19 = sand.u32 (!%p1614_p6), 1, %s1219_s13   ;;  %p1615_p13 = scmp.ne.s32.totalorder (!%p1614_p6), %s1603_s20, 0 }
  0x6c   : > { %212 = sbr.rel (%p1614_p6) target bundleno = 1561 (0x619), region = 32  ;;  %s1454_s2 = sshll.u32 (!%p1614_p6), %s1451_s19, 2 }
  0x6d   : > { %s215_s6 = scalar_lea.sflag (!%p1614_p6), [#allocation3], %s1451_s19  ;;  %s218_s8 = scalar_lea.vmem (!%p1614_p6), [#allocation2], %s1454_s2 }
  0x73   : > { %1198 = dma.done.wait (%p1615_p13), %s215_s6, 64  }
  0x74   : > { %1200 = vsyncadd (%p1615_p13), %s215_s6, 4294967232  ;;  %s223_s22 = sand.u32 1, %s1304_s18   ;;  %s227_s10 = scalar_lea.vmem [#allocation5], %s1454_s2 }
  0x75   : > { %s224_s27 = scalar_lea.sflag [#allocation6], %s223_s22 }
  0x76   : > { %1202 = dma.done.wait (%p1615_p13), %s224_s27, 64  }
  0x77   : > { %1204 = vsyncadd (%p1615_p13), %s224_s27, 4294967232  ;;  %p1616_p11 = scmp.eq.s32.totalorder %s1304_s18, 0 }
  0x79   : > { %1206 = dma.done.wait (%p1616_p11), [#allocation6], 128   ;;  %p1617_p3 = pmov %p1616_p11 }
  0x7a   : > { %v1240_v0 = vmov 0.0   ;;  %vm1241_vm0 = vmmov 0   ;;  %vm265_vm1 = vcmask 64512   ;;  %v264_v1 = vld [vmem:[%s227_s10] sm:$0xf]  ;;  %v1483_v5 = vld [vmem:[#allocation7] sm:$0xff] }
  0x7b   : > { %1208 = vsyncadd (%p1617_p3), [#allocation6], 4294967168  ;;  %902 = vmatprep.subr.bf16.mxu0 %v1240_v0  ;;  %904 = vmatprep.mubr.msk.bf16.mxu0 %vm1241_vm0, %v1240_v0  ;;  %v270_v2 = vsel %vm265_vm1, %v264_v1, 0  ;;  %v262_v3 = vld [vmem:[%s218_s8] sm:$0xf]  ;;  %v1487_v12 = vcombine.low %v264_v1, %v264_v1  ;;  %s1242_s18 = smov 96  }
  0x7c   : > { %908 = vmatprep.subr.bf16.mxu1 %v1240_v0  ;;  %910 = vmatprep.mubr.msk.bf16.mxu1 %vm1241_vm0, %v1240_v0  ;;  %v263_v4 = vmul.bf16 1052065461, %v262_v3  ;;  %s1243_s20 = smov 120   ;;  %s1244_s30 = smov 112   ;;  %vm332_vm2 = vcmask 1043456   ;;  %vm722_vm3 = vcmask 130048  }
  0x7d   : > { %903 = vmatpush3.bf16.xpose.msra.mxu0 %v270_v2  ;;  %327 = vrot.lane.b32.xlu1 %v1487_v12, %s1242_s18  ;;  %s1245_s4 = smov 104   ;;  %s1246_s25 = smov 88   ;;  %vm724_vm4 = vcmask 195584   ;;  %vm727_vm5 = vcmask 257024  }
  0x7e   : > { %920 = vmatprep.subr.bf16.mxu0 %v1240_v0  ;;  %v875_v13 = vcombine.low %v263_v4, %v263_v4  ;;  %s1247_s28 = smov 72   ;;  %s1248_s9 = smov 80  }
  0x7f   : > { %s1249_s26 = smov 8   ;;  %s1250_s24 = smov 16  }
  0x80   : > { %s1251_s5 = smov 24   ;;  %s883_s7 = sshll.u32 %s1227_s15, 6 }
  0x81   : > { %381 = vrot.lane.b32.xlu1 %v1487_v12, %s1243_s20  ;;  %s258_s11 = scalar_lea.vmem [#allocation8], %s1454_s2  ;;  %s1544_s27 = scalar_lea.hbm %s1596_s3, %s883_s7 }
  0x82   : > { %s744_s6 = sshll.u32 %s258_s11, 4  ;;  %s730_s10 = scalar_lea.sflag [#allocation4], %s1451_s19  ;;  %s1546_s6 = int_to_ptr.vmem [resolvable:$true] %s744_s6 }
  0x83   : > { %s1145_s15 = scalar_lea.vmem %s1546_s6, 64  ;;  %p1618_p0 = scmp.ne.s32.totalorder %s1612_s23, 0 }
  0x84   : > { %905 = vmatmul.mubr.msk.bf16.vlgmr.msra.gmra.mrb[0].mxu0 %vm265_vm1, %v263_v4  ;;  %p1146_p12 = scmp.ne.s32.totalorder %s1546_s6, %s1145_s15  ;;  %s1252_s2 = smov [#allocation8]  }
  0x85   : > { %922 = vmatprep.mubr.msk.bf16.mxu0 %vm1241_vm0, %v1240_v0  ;;  %491 = vrot.lane.b32.xlu1 %v1487_v12, %s1244_s30  ;;  %s1149_s18 = sshll.u32 %s1252_s2, 4  ;;  %s1150_s18 = int_to_ptr.vmem [resolvable:$false] %s1149_s18 }
  0x86   : > { %p1147_p5 = pnand %p1146_p12, %p1618_p0  ;;  %p1152_p1 = scmp.lt.s32.totalorder %s1546_s6, %s1150_s18 }
  0x88   : > { %p1148_p10 = pneg %p1147_p5 }
  0x89   : > { %489 = vrot.lane.b32.xlu1 %v875_v13, %s1244_s30 }
  0x8d   : > { %601 = vrot.lane.b32.xlu1 %v1487_v12, %s1245_s4 }
  0x91   : > { %599 = vrot.lane.b32.xlu1 %v875_v13, %s1245_s4 }
  0xef   : > { %v328_v19 = vpop.permute.xlu1 %327 }
  0xf0   : > { %v334_v20 = vsel %vm332_vm2, %v328_v19, 0 }
  0xf1   : > { %909 = vmatpush3.bf16.msra.mxu1 %v334_v20 }
  0xf2   : > { %914 = vmatprep.subr.bf16.mxu1 %v1240_v0 }
  0xf3   : > { %v382_v23 = vpop.permute.xlu1 %381 }
  0xf4   : > { %v387_v25 = vsel %vm265_vm1, %v382_v23, 0 }
  0xf7   : > { %v492_v27 = vpop.permute.xlu1 %491 }
  0xf8   : > { %v497_v30 = vsel %vm265_vm1, %v492_v27, 0 }
  0xfb   : > { %v490_v29 = vpop.permute.xlu1 %489 }
  0xff   : > { %v602_v31 = vpop.permute.xlu1 %601 }
 0x100   : > { %v607_v32 = vsel %vm265_vm1, %v602_v31, 0 }
 0x103   : > { %v600_v33 = vpop.permute.xlu1 %599 }
 0x157   : > { %v306_v6 = vpop.f32.mrb[0].mxu0 }
 0x158   : > { %v307_v7 = vadd.f32 %v306_v6, %v1483_v5  ;;  %v906_v8 = vpop.f32.mrb[1].mxu0 }
 0x159   : > { %v309_v9 = vpop.f32.mrb[2].mxu0 }
 0x15a   : > { %v907_v10 = vpop.f32.mrb[3].mxu0  ;;  %v312_v11 = vsel %vm265_vm1, %v307_v7, -inf }
 0x15b   : > { %313 = vmax.xlane.f32.xlu0 %v312_v11 }
 0x1e8   : > { %v314_v14 = vpop.xlane.xlu0 %313 }
 0x1e9   : > { %v315_v15 = vsub.f32 %v307_v7, %v314_v14 }
 0x1eb   : > { %v316_v16 = vmul.f32 1.442695, %v315_v15 }
 0x1ed   : > { %1041 = vpow2.f32 %v316_v16 }
 0x1f7   : > { %v1042_v17 = vpop.eup %1041 }
 0x1f8   : > { %v318_v18 = vsel %vm265_vm1, %v1042_v17, 0.0 }
 0x1f9   : > { %319 = vadd.xlane.f32.xlu0 %v318_v18 }
 0x20f   : > { %379 = vrot.lane.b32.xlu0 %v875_v13, %s1243_s20  ;;  %s1151_s20 = scalar_lea.vmem %s1150_s18, 128 }
 0x210   : > { %p1153_p2 = scmp.lt.s32.totalorder %s1151_s20, %s1145_s15 }
 0x212   : > { %p1154_p7 = por %p1153_p2, %p1152_p1 }
 0x214   : > { %p1155_p4 = pnand %p1154_p7, %p1148_p10 }
 0x286   : > { %v320_v21 = vpop.xlane.xlu0 %319 }
 0x287   : > { %1043 = vrcp.f32 %v320_v21 }
 0x28a   : > { %v380_v28 = vpop.permute.xlu0 %379 }
 0x291   : > { %v1044_v22 = vpop.eup %1043 }
 0x292   : > { %v322_v24 = vmul.f32 %v1044_v22, %v1042_v17 }
 0x294   : > { %v323_v26 = vpack.c.bf16 %v322_v24, %v322_v24 }
 0x296   : > { %911 = vmatmul.mubr.msk.bf16.vlgmr.msra.gmra.mrb[0].mxu1 %vm265_vm1, %v323_v26 }
 0x297   : > { %915 = vmatpush3.bf16.xpose.msra.mxu1 %v387_v25  ;;  %916 = vmatprep.mubr.msk.bf16.mxu1 %vm1241_vm0, %v1240_v0 }
 0x298   : > { %926 = vmatprep.subr.bf16.mxu1 %v1240_v0 }
 0x29e   : > { %917 = vmatmul.mubr.msk.bf16.vlgmr.msra.gmra.mrb[4].mxu1 %vm265_vm1, %v380_v28 }
 0x29f   : > { %927 = vmatpush3.bf16.xpose.msra.mxu1 %v497_v30  ;;  %928 = vmatprep.mubr.msk.bf16.mxu1 %vm1241_vm0, %v1240_v0 }
 0x2a0   : > { %938 = vmatprep.subr.bf16.mxu1 %v1240_v0 }
 0x2a6   : > { %929 = vmatmul.mubr.msk.bf16.vlgmr.msra.gmra.mrb[8].mxu1 %vm265_vm1, %v490_v29 }
 0x2a7   : > { %939 = vmatpush3.bf16.xpose.msra.mxu1 %v607_v32  ;;  %940 = vmatprep.mubr.msk.bf16.mxu1 %vm1241_vm0, %v1240_v0 }
 0x2ae   : > { %941 = vmatmul.mubr.msk.bf16.vlgmr.msra.gmra.mrb[12].mxu1 %vm265_vm1, %v600_v33 }
 0x369   : > { %v1511_v34 = vpop.f32.mrb[0].mxu1 }
 0x36a   : > { %v912_v35 = vpop.f32.mrb[1].mxu1 }
 0x36b   : > { %v373_v36 = vpop.f32.mrb[2].mxu1 }
 0x36c   : > { %v913_v37 = vpop.f32.mrb[3].mxu1 }
 0x371   : > { %v423_v38 = vpop.f32.mrb[4].mxu1 }
 0x372   : > { %v424_v39 = vadd.f32 %v423_v38, %v1483_v5  ;;  %v918_v40 = vpop.f32.mrb[5].mxu1 }
 0x373   : > { %v426_v41 = vpop.f32.mrb[6].mxu1 }
 0x374   : > { %v919_v42 = vpop.f32.mrb[7].mxu1  ;;  %v429_v43 = vsel %vm265_vm1, %v424_v39, -inf }
 0x375   : > { %430 = vmax.xlane.f32.xlu1 %v429_v43 }
 0x379   : > { %v533_v44 = vpop.f32.mrb[8].mxu1 }
 0x37a   : > { %v534_v45 = vadd.f32 %v533_v44, %v1483_v5  ;;  %v930_v46 = vpop.f32.mrb[9].mxu1 }
 0x37b   : > { %v536_v47 = vpop.f32.mrb[10].mxu1 }
 0x37c   : > { %v931_v48 = vpop.f32.mrb[11].mxu1  ;;  %v539_v49 = vsel %vm265_vm1, %v534_v45, -inf }
 0x37d   : > { %540 = vmax.xlane.f32.xlu0 %v539_v49 }
 0x381   : > { %v643_v50 = vpop.f32.mrb[12].mxu1 }
 0x382   : > { %v644_v51 = vadd.f32 %v643_v50, %v1483_v5  ;;  %v942_v52 = vpop.f32.mrb[13].mxu1 }
 0x383   : > { %v646_v53 = vpop.f32.mrb[14].mxu1 }
 0x384   : > { %v943_v54 = vpop.f32.mrb[15].mxu1  ;;  %v649_v55 = vsel %vm265_vm1, %v644_v51, -inf }
 0x385   : > { %650 = vmax.xlane.f32.xlu1 %v649_v55 }
 0x396   : > { %441 = vrot.lane.b32.xlu1 %v1487_v12, %s1246_s25 }
 0x402   : > { %v431_v56 = vpop.xlane.xlu1 %430 }
 0x403   : > { %v432_v57 = vsub.f32 %v424_v39, %v431_v56 }
 0x405   : > { %v433_v58 = vmul.f32 1.442695, %v432_v57 }
 0x407   : > { %1045 = vpow2.f32 %v433_v58 }
 0x40a   : > { %v541_v59 = vpop.xlane.xlu0 %540 }
 0x40b   : > { %v542_v60 = vsub.f32 %v534_v45, %v541_v59 }
 0x40d   : > { %v543_v61 = vmul.f32 1.442695, %v542_v60 }
 0x40f   : > { %1047 = vpow2.f32 %v543_v61 }
 0x411   : > { %v1046_v62 = vpop.eup %1045 }
 0x412   : > { %v651_v63 = vpop.xlane.xlu1 %650  ;;  %v435_v1 = vsel %vm265_vm1, %v1046_v62, 0.0 }
 0x413   : > { %v652_v2 = vsub.f32 %v644_v51, %v651_v63  ;;  %436 = vadd.xlane.f32.xlu0 %v435_v1 }
 0x415   : > { %v653_v3 = vmul.f32 1.442695, %v652_v2 }
 0x416   : > { %v442_v4 = vpop.permute.xlu1 %441 }
 0x417   : > { %1049 = vpow2.f32 %v653_v3  ;;  %v447_v5 = vsel %vm332_vm2, %v442_v4, 0 }
 0x418   : > { %921 = vmatpush3.bf16.msra.mxu0 %v447_v5 }
 0x419   : > { %v1048_v6 = vpop.eup %1047  ;;  %932 = vmatprep.subr.bf16.mxu0 %v1240_v0 }
 0x41a   : > { %v545_v7 = vsel %vm265_vm1, %v1048_v6, 0.0 }
 0x41b   : > { %546 = vadd.xlane.f32.xlu1 %v545_v7 }
 0x421   : > { %v1050_v8 = vpop.eup %1049 }
 0x422   : > { %v655_v9 = vsel %vm265_vm1, %v1050_v8, 0.0 }
 0x423   : > { %656 = vadd.xlane.f32.xlu0 %v655_v9 }
 0x42c   : > { %661 = vrot.lane.b32.xlu1 %v1487_v12, %s1247_s28 }
 0x439   : > { %551 = vrot.lane.b32.xlu0 %v1487_v12, %s1248_s9 }
 0x4a0   : > { %v437_v10 = vpop.xlane.xlu0 %436 }
 0x4a1   : > { %1051 = vrcp.f32 %v437_v10 }
 0x4a8   : > { %v547_v11 = vpop.xlane.xlu1 %546 }
 0x4a9   : > { %1053 = vrcp.f32 %v547_v11 }
 0x4ab   : > { %v1052_v13 = vpop.eup %1051 }
 0x4ac   : > { %v439_v14 = vmul.f32 %v1052_v13, %v1046_v62  ;;  %v662_v20 = vpop.permute.xlu1 %661 }
 0x4ad   : > { %v667_v22 = vsel %vm332_vm2, %v662_v20, 0 }
 0x4ae   : > { %v440_v15 = vpack.c.bf16 %v439_v14, %v439_v14 }
 0x4b0   : > { %v657_v16 = vpop.xlane.xlu0 %656  ;;  %923 = vmatmul.mubr.msk.bf16.vlgmr.msra.gmra.mrb[4].mxu0 %vm265_vm1, %v440_v15 }
 0x4b1   : > { %1055 = vrcp.f32 %v657_v16  ;;  %934 = vmatprep.mubr.msk.bf16.mxu0 %vm1241_vm0, %v1240_v0 }
 0x4b3   : > { %v1054_v17 = vpop.eup %1053 }
 0x4b4   : > { %v549_v18 = vmul.f32 %v1054_v17, %v1048_v6  ;;  %v552_v19 = vpop.permute.xlu0 %551 }
 0x4b5   : > { %v557_v12 = vsel %vm332_vm2, %v552_v19, 0 }
 0x4b6   : > { %933 = vmatpush3.bf16.msra.mxu0 %v557_v12  ;;  %v550_v21 = vpack.c.bf16 %v549_v18, %v549_v18 }
 0x4b7   : > { %944 = vmatprep.subr.bf16.mxu0 %v1240_v0 }
 0x4b9   : > { %935 = vmatmul.mubr.msk.bf16.vlgmr.msra.gmra.mrb[8].mxu0 %vm265_vm1, %v550_v21 }
 0x4ba   : > { %945 = vmatpush3.bf16.msra.mxu0 %v667_v22  ;;  %946 = vmatprep.mubr.msk.bf16.mxu0 %vm1241_vm0, %v1240_v0 }
 0x4bb   : > { %v1056_v23 = vpop.eup %1055 }
 0x4bc   : > { %v659_v24 = vmul.f32 %v1056_v23, %v1050_v8 }
 0x4be   : > { %v660_v25 = vpack.c.bf16 %v659_v24, %v659_v24 }
 0x4c1   : > { %947 = vmatmul.mubr.msk.bf16.vlgmr.msra.gmra.mrb[12].mxu0 %vm265_vm1, %v660_v25 }
 0x583   : > { %v483_v26 = vpop.f32.mrb[4].mxu0 }
 0x584   : > { %710 = vrot.lane.b32.xlu1 %v483_v26, %s1249_s26  ;;  %v924_v27 = vpop.f32.mrb[5].mxu0 }
 0x585   : > { %v486_v28 = vpop.f32.mrb[6].mxu0 }
 0x586   : > { %v925_v29 = vpop.f32.mrb[7].mxu0 }
 0x58c   : > { %v593_v30 = vpop.f32.mrb[8].mxu0 }
 0x58d   : > { %714 = vrot.lane.b32.xlu0 %v593_v30, %s1250_s24  ;;  %v936_v31 = vpop.f32.mrb[9].mxu0 }
 0x58e   : > { %v596_v32 = vpop.f32.mrb[10].mxu0 }
 0x58f   : > { %v937_v33 = vpop.f32.mrb[11].mxu0 }
 0x594   : > { %v703_v0 = vpop.f32.mrb[12].mxu0 }
 0x595   : > { %718 = vrot.lane.b32.xlu1 %v703_v0, %s1251_s5  ;;  %v948_v35 = vpop.f32.mrb[13].mxu0 }
 0x596   : > { %v706_v36 = vpop.f32.mrb[14].mxu0 }
 0x597   : > { %v949_v37 = vpop.f32.mrb[15].mxu0 }
 0x5f6   : > { %v711_v38 = vpop.permute.xlu1 %710 }
 0x5f7   : > { %v721_v40 = vsel %vm265_vm1, %v1511_v34, %v711_v38 }
 0x5ff   : > { %v715_v39 = vpop.permute.xlu0 %714 }
 0x600   : > { %v723_v41 = vsel %vm722_vm3, %v721_v40, %v715_v39 }
 0x607   : > { %v719_v42 = vpop.permute.xlu1 %718 }
 0x608   : > { %v725_v43 = vsel %vm724_vm4, %v723_v41, %v719_v42 }
 0x609   : > { %v726_v44 = vpack.c.bf16 %v725_v43, %v725_v43 }
 0x60b   : > { %728 = vst.msk [vmem:[%s258_s11] sm:$0xf] %vm727_vm5, %v726_v44 }
 0x60c   : > { %1158 = shalt.err (!%p1155_p4)
}
 0x60d   : > { %s1159_s19 = scalar_lea.hbm %s1544_s27, 64  ;;  %s1163_s25 = scalar_lea.hbm %s1596_s3, 128 }
 0x60e   : > { %p1160_p8 = scmp.ne.s32.totalorder %s1544_s27, %s1159_s19  ;;  %p1164_p13 = scmp.lt.u32.totalorder %s1544_s27, %s1596_s3 }
 0x60f   : > { %p1165_p11 = scmp.lt.u32.totalorder %s1163_s25, %s1159_s19  ;;  %p1167_p12 = scmp.lt.u32.totalorder %s1159_s19, %s1544_s27 }
 0x610   : > { %p1161_p9 = pnand %p1160_p8, %p1618_p0 }
 0x611   : > { %p1166_p3 = por %p1165_p11, %p1164_p13 }
 0x612   : > { %p1162_p6 = pneg %p1161_p9 }
 0x613   : > { %p1168_p5 = por %p1167_p12, %p1166_p3 }
 0x615   : > { %p1169_p10 = pnand %p1168_p5, %p1162_p6 }
 0x617   : > { %1172 = shalt.err (!%p1169_p10)
}
 0x618   : > { %958 = dma.vmem_to_hbm [thread:$0]  (%p1618_p0), %s1546_s6, 64, %s1544_s27, %s730_s10  }
 0x619 PF: > { %s756_s26 = sand.u32 1, %s1215_s12   ;;  %p1619_p1 = scmp.ne.s32.totalorder %s1604_s21, 0 }
 0x61a   : > { %p1620_p2 = scmp.ge.s32.totalorder %s1235_s17, 2  ;;  %s757_s24 = scalar_lea.sflag [#allocation4], %s756_s26 }
 0x61c   : > { %p972_p7 = pnand %p1620_p2, %p1619_p1 }
 0x61e   : > { %1210 = dma.done.wait (!%p972_p7), %s757_s24, 64  }
 0x61f   : > { %1212 = vsyncadd (!%p972_p7), %s757_s24, 4294967232  ;;  %s22_s17 = sadd.s32 1, %s1235_s17   ;;  %s1621_s23 = sld [smem:[#allocation13_spill]] }
 0x620   : > { %p19_p4 = scmp.ge.s32.totalorder %s22_s17, 4   ;;  %s1622_s12 = smov %s1219_s13 }
 0x621   : > { %s1623_s13 = smov %s1223_s14  ;;  %s1624_s14 = smov %s1378_s29 }
 0x622   : > { %s1625_s15 = smov %s1231_s16  ;;  %21 = sbr.rel (!%p19_p4) target bundleno = 10 (0xa), region = 95 }
 0x625   : > { %s1626_s16 = smov %s1621_s23 }
 0x629   :  { %762 = vsyncpa [#allocation3], 1 }
 0x62a   :  { %764 = vsyncpa [#allocation3 + $0x1], 1 }
 0x62b   :  { %765 = vsyncpa [#allocation6], 1 }
 0x62c   :  { %767 = vsyncpa [#allocation6 + $0x1], 1 }
 0x62d   :  { %768 = vsyncpa [#allocation4], 1 }
 0x62e   :  { %770 = vsyncpa [#allocation4 + $0x1], 1 }

// kernel: transformer_decoder_forward.37
= control target key start
LH: loop header
LB: loop body
LE: loop exit
PB: predicated region body
PF: predicated region fallthrough
CT: control target
= control target key end

     0   :  { %8 = vsyncpa [#allocation3], 0  ;;  %s323_s0 = inlined_call_operand.hbm [shape: bf16[16,32], index: 0, kind: input, shape index: {}]   ;;  %s324_s1 = inlined_call_operand.hbm [shape: f32[1,32], index: 1, kind: input, shape index: {}]   ;;  %s325_s2 = inlined_call_operand.hbm [shape: f32[1,32], index: 2, kind: input, shape index: {}]   ;;  %s326_s3 = inlined_call_operand.hbm [shape: f32[16,32], index: 3, kind: output, shape index: {}]  }
   0x1   :  { %9 = vsyncpa [#allocation6], 0 }
   0x2   :  { %10 = vsyncpa [#allocation4], 0  ;;  %s234_s12 = smov [#allocation5]   ;;  %s235_s14 = smov [#allocation2]  }
   0x3   :  { %s29_s13 = sshll.u32 %s234_s12, 4  ;;  %s16_s15 = sshll.u32 %s235_s14, 4  ;;  %s30_s13 = int_to_ptr.vmem [resolvable:$true] %s29_s13  ;;  %s262_s15 = int_to_ptr.vmem [resolvable:$true] %s16_s15 }
   0x4   :  { %s140_s18 = scalar_lea.hbm %s324_s1, 16 }
   0x5   :  { %p141_p0 = scmp.ne.s32.totalorder %s324_s1, %s140_s18  ;;  %p144_p1 = scmp.lt.u32.totalorder %s140_s18, %s324_s1 }
   0x7   :  { %p146_p2 = pnand %p144_p1, %p141_p0 }
   0x9   :  { %149 = shalt.err (!%p146_p2)
}
   0xa   :  { %s150_s23 = scalar_lea.vmem %s30_s13, 16  ;;  %s154_s24 = scalar_lea.vmem %s30_s13, 32 }
   0xb   :  { %p151_p3 = scmp.ne.s32.totalorder %s30_s13, %s150_s23  ;;  %p155_p4 = scmp.lt.s32.totalorder %s30_s13, %s30_s13 }
   0xc   :  { %p156_p5 = scmp.lt.s32.totalorder %s154_s24, %s150_s23 }
   0xe   :  { %p157_p6 = por %p156_p5, %p155_p4 }
  0x10   :  { %p158_p7 = pnand %p157_p6, %p151_p3 }
  0x12   :  { %161 = shalt.err (!%p158_p7)
}
  0x13   :  { %32 = dma.hbm_to_vmem [thread:$0]  %s324_s1, 16, %s30_s13, [#allocation6]  }
  0x14   :  { %s162_s29 = scalar_lea.hbm %s323_s0, 128 }
  0x15   :  { %p163_p8 = scmp.ne.s32.totalorder %s323_s0, %s162_s29  ;;  %p166_p9 = scmp.lt.u32.totalorder %s162_s29, %s323_s0 }
  0x17   :  { %p168_p10 = pnand %p166_p9, %p163_p8 }
  0x19   :  { %171 = shalt.err (!%p168_p10)
}
  0x1a   :  { %s172_s7 = scalar_lea.vmem %s262_s15, 128  ;;  %p177_p12 = scmp.lt.s32.totalorder %s262_s15, %s262_s15 }
  0x1b   :  { %p173_p11 = scmp.ne.s32.totalorder %s262_s15, %s172_s7  ;;  %p178_p13 = scmp.lt.s32.totalorder %s172_s7, %s172_s7 }
  0x1d   :  { %p179_p0 = por %p178_p13, %p177_p12 }
  0x1f   :  { %p180_p1 = pnand %p179_p0, %p173_p11 }
  0x21   :  { %183 = shalt.err (!%p180_p1)
}
  0x22   :  { %s236_s1 = smov 64   ;;  %s237_s8 = smov 4  }
  0x23   :  { %22 = dma.hbm_to_vmem [thread:$0]  %s323_s0, 128, %s262_s15, [#allocation3], %s236_s1, %s236_s1, %s237_s8  }
  0x24   :  { %s238_s11 = smov [#allocation7]   ;;  %s184_s16 = scalar_lea.hbm %s325_s2, 16 }
  0x25   :  { %s39_s12 = sshll.u32 %s238_s11, 4  ;;  %p185_p2 = scmp.ne.s32.totalorder %s325_s2, %s184_s16  ;;  %s40_s12 = int_to_ptr.vmem [resolvable:$true] %s39_s12 }
  0x26   :  { %p188_p3 = scmp.lt.u32.totalorder %s184_s16, %s325_s2 }
  0x28   :  { %p190_p4 = pnand %p188_p3, %p185_p2 }
  0x2a   :  { %193 = shalt.err (!%p190_p4)
}
  0x2b   :  { %s194_s21 = scalar_lea.vmem %s40_s12, 16  ;;  %s198_s0 = scalar_lea.vmem %s40_s12, 32 }
  0x2c   :  { %p195_p5 = scmp.ne.s32.totalorder %s40_s12, %s194_s21  ;;  %p199_p6 = scmp.lt.s32.totalorder %s40_s12, %s40_s12 }
  0x2d   :  { %p200_p7 = scmp.lt.s32.totalorder %s198_s0, %s194_s21 }
  0x2f   :  { %p201_p8 = por %p200_p7, %p199_p6 }
  0x31   :  { %p202_p9 = pnand %p201_p8, %p195_p5 }
  0x33   :  { %205 = shalt.err (!%p202_p9)
}
  0x34   :  { %42 = dma.hbm_to_vmem [thread:$0]  %s325_s2, 16, %s40_s12, [#allocation6]  }
  0x35   :  { %228 = dma.done.wait [#allocation3], 128  }
  0x36   :  { %229 = vsyncadd [#allocation3], 4294967168 }
  0x37   :  { %230 = dma.done.wait [#allocation6], 32  }
  0x38   :  { %231 = vsyncadd [#allocation6], 4294967264  ;;  %v125_v0 = vld [vmem:[#allocation2] sm:$0xff]   ;;  %vm56_vm0 = vcmask 261120   ;;  %v122_v22 = vld [vmem:[#allocation5] ss:$0 sm:$0xff] }
  0x39   :  { %v126_v1 = vunpack.c.l.bf16 %v125_v0  ;;  %v127_v2 = vunpack.c.h.bf16 %v125_v0  ;;  %v123_v24 = vld [vmem:[#allocation7] ss:$0 sm:$0xff]  ;;  %s239_s2 = smov [#allocation8]  }
  0x3a   :  { %s109_s23 = sshll.u32 %s239_s2, 4  ;;  %s110_s23 = int_to_ptr.vmem [resolvable:$true] %s109_s23 }
  0x3b   :  { %v57_v3 = vsel %vm56_vm0, %v126_v1, 0.0  ;;  %v60_v4 = vsel %vm56_vm0, %v127_v2, 0.0  ;;  %s206_s24 = scalar_lea.vmem %s110_s23, 256  ;;  %p211_p11 = scmp.lt.s32.totalorder %s110_s23, %s110_s23 }
  0x3c   :  { %58 = vadd.xlane.f32.xlu0 %v57_v3  ;;  %p207_p10 = scmp.ne.s32.totalorder %s110_s23, %s206_s24  ;;  %p212_p12 = scmp.lt.s32.totalorder %s206_s24, %s206_s24 }
  0x3e   :  { %p213_p13 = por %p212_p12, %p211_p11 }
  0x40   :  { %61 = vadd.xlane.f32.xlu0 %v60_v4  ;;  %p214_p0 = pnand %p213_p13, %p207_p10 }
  0xc9   :  { %v59_v5 = vpop.xlane.xlu0 %58 }
  0xca   :  { %v64_v6 = vmul.f32 0.03125, %v59_v5 }
  0xcc   :  { %v66_v7 = vsub.f32 %v126_v1, %v64_v6 }
  0xcd   :  { %v62_v8 = vpop.xlane.xlu0 %61 }
  0xce   :  { %v65_v9 = vmul.f32 0.03125, %v62_v8  ;;  %v68_v10 = vmul.f32 %v66_v7, %v66_v7 }
  0xd0   :  { %v67_v11 = vsub.f32 %v127_v2, %v65_v9  ;;  %v70_v12 = vsel %vm56_vm0, %v68_v10, 0.0 }
  0xd1   :  { %71 = vadd.xlane.f32.xlu1 %v70_v12 }
  0xd2   :  { %v69_v13 = vmul.f32 %v67_v11, %v67_v11 }
  0xd4   :  { %v73_v14 = vsel %vm56_vm0, %v69_v13, 0.0 }
  0xd5   :  { %74 = vadd.xlane.f32.xlu1 %v73_v14 }
 0x15e   :  { %v72_v15 = vpop.xlane.xlu1 %71 }
 0x15f   :  { %v76_v16 = vmul.f32 0.03125, %v72_v15 }
 0x161   :  { %v78_v17 = vadd.f32 1e-05, %v76_v16 }
 0x162   :  { %v75_v18 = vpop.xlane.xlu1 %74 }
 0x163   :  { %136 = vrsqrt.f32 %v78_v17  ;;  %v77_v19 = vmul.f32 0.03125, %v75_v18 }
 0x165   :  { %v79_v20 = vadd.f32 1e-05, %v77_v19 }
 0x167   :  { %138 = vrsqrt.f32 %v79_v20 }
 0x16d   :  { %v137_v21 = vpop.eup %136 }
 0x16e   :  { %v82_v23 = vmul.f32 %v137_v21, %v66_v7 }
 0x170   :  { %v91_v25 = vmul.f32 %v122_v22, %v82_v23 }
 0x171   :  { %v139_v26 = vpop.eup %138 }
 0x172   :  { %v83_v27 = vmul.f32 %v139_v26, %v67_v11  ;;  %v100_v28 = vadd.f32 %v123_v24, %v91_v25 }
 0x174   :  { %v92_v29 = vmul.f32 %v122_v22, %v83_v27  ;;  %102 = vst.msk [vmem:[#allocation8] sm:$0xff] %vm56_vm0, %v100_v28 }
 0x176   :  { %v101_v30 = vadd.f32 %v123_v24, %v92_v29 }
 0x178   :  { %103 = vst.msk [vmem:[#allocation8 + $0x8] sm:$0xff] %vm56_vm0, %v101_v30 }
 0x179   :  { %217 = shalt.err (!%p214_p0)
}
 0x17a   :  { %s218_s27 = scalar_lea.hbm %s326_s3, 256 }
 0x17b   :  { %p219_p1 = scmp.ne.s32.totalorder %s326_s3, %s218_s27  ;;  %p222_p2 = scmp.lt.u32.totalorder %s218_s27, %s326_s3 }
 0x17d   :  { %p224_p3 = pnand %p222_p2, %p219_p1 }
 0x17f   :  { %227 = shalt.err (!%p224_p3)
}
 0x180   :  { %s240_s5 = smov 128   ;;  %s241_s6 = smov 8  }
 0x181   :  { %115 = dma.vmem_to_hbm [thread:$0]  %s110_s23, 256, %s326_s3, [#allocation4], %s240_s5, %s240_s5, %s241_s6  }
 0x182   :  { %232 = dma.done.wait [#allocation4], 256  }
 0x183   :  { %233 = vsyncadd [#allocation4], 4294967040 }
 0x184   :  { %119 = vsyncpa [#allocation3], 1 }
 0x185   :  { %120 = vsyncpa [#allocation6], 1 }
 0x186   :  { %121 = vsyncpa [#allocation4], 1 }

// kernel: transformer_decoder_forward.27
= control target key start
LH: loop header
LB: loop body
LE: loop exit
PB: predicated region body
PF: predicated region fallthrough
CT: control target
= control target key end

     0   :  { %12 = vsyncpa [#allocation4], 0  ;;  %s820_s0 = inlined_call_operand.hbm [shape: bf16[16,32], index: 0, kind: input, shape index: {}]   ;;  %s821_s1 = inlined_call_operand.hbm [shape: bf16[32,64], index: 1, kind: input, shape index: {}]   ;;  %s822_s2 = inlined_call_operand.hbm [shape: f32[1,64], index: 2, kind: input, shape index: {}]   ;;  %s823_s3 = inlined_call_operand.hbm [shape: bf16[64,32], index: 3, kind: input, shape index: {}]   ;;  %s824_s4 = inlined_call_operand.hbm [shape: f32[1,32], index: 4, kind: input, shape index: {}]   ;;  %s825_s5 = inlined_call_operand.hbm [shape: f32[1,32], index: 5, kind: input, shape index: {}]   ;;  %s826_s6 = inlined_call_operand.hbm [shape: f32[1,32], index: 6, kind: input, shape index: {}]   ;;  %s827_s7 = inlined_call_operand.hbm [shape: bf16[16,32], index: 7, kind: output, shape index: {}]  }
   0x1   :  { %13 = vsyncpa [#allocation7], 0 }
   0x2   :  { %14 = vsyncpa [#allocation10], 0 }
   0x3   :  { %15 = vsyncpa [#allocation13], 0 }
   0x4   :  { %16 = vsyncpa [#allocation5], 0  ;;  %s637_s24 = smov [#allocation6]   ;;  %s638_s26 = smov [#allocation9]  }
   0x5   :  { %s34_s25 = sshll.u32 %s637_s24, 4  ;;  %s56_s27 = sshll.u32 %s638_s26, 4  ;;  %s35_s25 = int_to_ptr.vmem [resolvable:$true] %s34_s25  ;;  %s689_s27 = int_to_ptr.vmem [resolvable:$true] %s56_s27 }
   0x6   :  { %s451_s30 = scalar_lea.hbm %s821_s1, 256 }
   0x7   :  { %p452_p0 = scmp.ne.s32.totalorder %s821_s1, %s451_s30  ;;  %p455_p1 = scmp.lt.u32.totalorder %s451_s30, %s821_s1 }
   0x9   :  { %p457_p2 = pnand %p455_p1, %p452_p0 }
   0xb   :  { %460 = shalt.err (!%p457_p2)
}
   0xc   :  { %s461_s12 = scalar_lea.vmem %s35_s25, 256  ;;  %p466_p4 = scmp.lt.s32.totalorder %s35_s25, %s35_s25 }
   0xd   :  { %p462_p3 = scmp.ne.s32.totalorder %s35_s25, %s461_s12  ;;  %p467_p5 = scmp.lt.s32.totalorder %s461_s12, %s461_s12 }
   0xf   :  { %p468_p6 = por %p467_p5, %p466_p4 }
  0x11   :  { %p469_p7 = pnand %p468_p6, %p462_p3 }
  0x13   :  { %472 = shalt.err (!%p469_p7)
}
  0x14   :  { %s639_s13 = smov 64   ;;  %s640_s14 = smov 4  }
  0x15   :  { %40 = dma.hbm_to_vmem [thread:$0]  %s821_s1, 256, %s35_s25, [#allocation7], %s639_s13, %s639_s13, %s640_s14  }
  0x16   :  { %s473_s19 = scalar_lea.hbm %s823_s3, 512 }
  0x17   :  { %p474_p8 = scmp.ne.s32.totalorder %s823_s3, %s473_s19  ;;  %p477_p9 = scmp.lt.u32.totalorder %s473_s19, %s823_s3 }
  0x19   :  { %p479_p10 = pnand %p477_p9, %p474_p8 }
  0x1b   :  { %482 = shalt.err (!%p479_p10)
}
  0x1c   :  { %s483_s24 = scalar_lea.vmem %s689_s27, 512  ;;  %p488_p12 = scmp.lt.s32.totalorder %s689_s27, %s689_s27 }
  0x1d   :  { %p484_p11 = scmp.ne.s32.totalorder %s689_s27, %s483_s24  ;;  %p489_p13 = scmp.lt.s32.totalorder %s483_s24, %s483_s24 }
  0x1f   :  { %p490_p0 = por %p489_p13, %p488_p12 }
  0x21   :  { %p491_p1 = pnand %p490_p0, %p484_p11 }
  0x23   :  { %494 = shalt.err (!%p491_p1)
}
  0x24   :  { %62 = dma.hbm_to_vmem [thread:$0]  %s823_s3, 512, %s689_s27, [#allocation10], %s639_s13, %s639_s13, %s640_s14  }
  0x25   :  { %s641_s26 = smov [#allocation12]   ;;  %s642_s29 = smov [#allocation3]  }
  0x26   :  { %s79_s28 = sshll.u32 %s641_s26, 4  ;;  %s22_s30 = sshll.u32 %s642_s29, 4  ;;  %s80_s28 = int_to_ptr.vmem [resolvable:$true] %s79_s28  ;;  %s726_s30 = int_to_ptr.vmem [resolvable:$true] %s22_s30 }
  0x27   :  { %s495_s10 = scalar_lea.hbm %s825_s5, 16 }
  0x28   :  { %p496_p2 = scmp.ne.s32.totalorder %s825_s5, %s495_s10  ;;  %p499_p3 = scmp.lt.u32.totalorder %s495_s10, %s825_s5 }
  0x2a   :  { %p501_p4 = pnand %p499_p3, %p496_p2 }
  0x2c   :  { %504 = shalt.err (!%p501_p4)
}
  0x2d   :  { %s505_s3 = scalar_lea.vmem %s80_s28, 16  ;;  %s509_s27 = scalar_lea.vmem %s80_s28, 32 }
  0x2e   :  { %p506_p5 = scmp.ne.s32.totalorder %s80_s28, %s505_s3  ;;  %p510_p6 = scmp.lt.s32.totalorder %s80_s28, %s80_s28 }
  0x2f   :  { %p511_p7 = scmp.lt.s32.totalorder %s509_s27, %s505_s3 }
  0x31   :  { %p512_p8 = por %p511_p7, %p510_p6 }
  0x33   :  { %p513_p9 = pnand %p512_p8, %p506_p5 }
  0x35   :  { %516 = shalt.err (!%p513_p9)
}
  0x36   :  { %82 = dma.hbm_to_vmem [thread:$0]  %s825_s5, 16, %s80_s28, [#allocation13]  }
  0x37   :  { %s517_s21 = scalar_lea.hbm %s820_s0, 128 }
  0x38   :  { %p518_p10 = scmp.ne.s32.totalorder %s820_s0, %s517_s21  ;;  %p521_p11 = scmp.lt.u32.totalorder %s517_s21, %s820_s0 }
  0x3a   :  { %p523_p12 = pnand %p521_p11, %p518_p10 }
  0x3c   :  { %526 = shalt.err (!%p523_p12)
}
  0x3d   :  { %s527_s25 = scalar_lea.vmem %s726_s30, 128  ;;  %p532_p0 = scmp.lt.s32.totalorder %s726_s30, %s726_s30 }
  0x3e   :  { %p528_p13 = scmp.ne.s32.totalorder %s726_s30, %s527_s25  ;;  %p533_p1 = scmp.lt.s32.totalorder %s527_s25, %s527_s25 }
  0x40   :  { %p534_p2 = por %p533_p1, %p532_p0 }
  0x42   :  { %p535_p3 = pnand %p534_p2, %p528_p13 }
  0x44   :  { %538 = shalt.err (!%p535_p3)
}
  0x45   :  { %28 = dma.hbm_to_vmem [thread:$0]  %s820_s0, 128, %s726_s30, [#allocation4], %s639_s13, %s639_s13, %s640_s14  }
  0x46   :  { %s643_s28 = smov [#allocation8]   ;;  %s644_s8 = smov [#allocation11]  }
  0x47   :  { %s47_s29 = sshll.u32 %s643_s28, 4  ;;  %s69_s9 = sshll.u32 %s644_s8, 4  ;;  %s48_s29 = int_to_ptr.vmem [resolvable:$true] %s47_s29  ;;  %s70_s9 = int_to_ptr.vmem [resolvable:$true] %s69_s9 }
  0x48   :  { %s539_s12 = scalar_lea.hbm %s822_s2, 16 }
  0x49   :  { %p540_p4 = scmp.ne.s32.totalorder %s822_s2, %s539_s12  ;;  %p543_p5 = scmp.lt.u32.totalorder %s539_s12, %s822_s2 }
  0x4b   :  { %p545_p6 = pnand %p543_p5, %p540_p4 }
  0x4d   :  { %548 = shalt.err (!%p545_p6)
}
  0x4e   :  { %s549_s0 = scalar_lea.vmem %s48_s29, 16  ;;  %s553_s30 = scalar_lea.vmem %s48_s29, 32 }
  0x4f   :  { %p550_p7 = scmp.ne.s32.totalorder %s48_s29, %s549_s0  ;;  %p554_p8 = scmp.lt.s32.totalorder %s48_s29, %s48_s29 }
  0x50   :  { %p555_p9 = scmp.lt.s32.totalorder %s553_s30, %s549_s0 }
  0x52   :  { %p556_p10 = por %p555_p9, %p554_p8 }
  0x54   :  { %p557_p11 = pnand %p556_p10, %p550_p7 }
  0x56   :  { %560 = shalt.err (!%p557_p11)
}
  0x57   :  { %50 = dma.hbm_to_vmem [thread:$0]  %s822_s2, 16, %s48_s29, [#allocation7]  }
  0x58   :  { %s561_s21 = scalar_lea.hbm %s824_s4, 16 }
  0x59   :  { %p562_p12 = scmp.ne.s32.totalorder %s824_s4, %s561_s21  ;;  %p565_p13 = scmp.lt.u32.totalorder %s561_s21, %s824_s4 }
  0x5b   :  { %p567_p0 = pnand %p565_p13, %p562_p12 }
  0x5d   :  { %570 = shalt.err (!%p567_p0)
}
  0x5e   :  { %s571_s25 = scalar_lea.vmem %s70_s9, 16  ;;  %s575_s5 = scalar_lea.vmem %s70_s9, 32 }
  0x5f   :  { %p572_p1 = scmp.ne.s32.totalorder %s70_s9, %s571_s25  ;;  %p576_p2 = scmp.lt.s32.totalorder %s70_s9, %s70_s9 }
  0x60   :  { %p577_p3 = scmp.lt.s32.totalorder %s575_s5, %s571_s25 }
  0x62   :  { %p578_p4 = por %p577_p3, %p576_p2 }
  0x64   :  { %p579_p5 = pnand %p578_p4, %p572_p1 }
  0x66   :  { %582 = shalt.err (!%p579_p5)
}
  0x67   :  { %72 = dma.hbm_to_vmem [thread:$0]  %s824_s4, 16, %s70_s9, [#allocation10]  }
  0x68   :  { %s645_s28 = smov [#allocation14]   ;;  %s583_s11 = scalar_lea.hbm %s826_s6, 16 }
  0x69   :  { %s89_s29 = sshll.u32 %s645_s28, 4  ;;  %p584_p6 = scmp.ne.s32.totalorder %s826_s6, %s583_s11  ;;  %s90_s29 = int_to_ptr.vmem [resolvable:$true] %s89_s29 }
  0x6a   :  { %p587_p7 = scmp.lt.u32.totalorder %s583_s11, %s826_s6 }
  0x6c   :  { %p589_p8 = pnand %p587_p7, %p584_p6 }
  0x6e   :  { %592 = shalt.err (!%p589_p8)
}
  0x6f   :  { %s593_s27 = scalar_lea.vmem %s90_s29, 16  ;;  %s597_s4 = scalar_lea.vmem %s90_s29, 32 }
  0x70   :  { %p594_p9 = scmp.ne.s32.totalorder %s90_s29, %s593_s27  ;;  %p598_p10 = scmp.lt.s32.totalorder %s90_s29, %s90_s29 }
  0x71   :  { %p599_p11 = scmp.lt.s32.totalorder %s597_s4, %s593_s27 }
  0x73   :  { %p600_p12 = por %p599_p11, %p598_p10 }
  0x75   :  { %p601_p13 = pnand %p600_p12, %p594_p9 }
  0x77   :  { %604 = shalt.err (!%p601_p13)
}
  0x78   :  { %92 = dma.hbm_to_vmem [thread:$0]  %s826_s6, 16, %s90_s29, [#allocation13]  }
  0x79   :  { %627 = dma.done.wait [#allocation4], 128  }
  0x7a   :  { %628 = vsyncadd [#allocation4], 4294967168 }
  0x7b   :  { %629 = dma.done.wait [#allocation7], 272  }
  0x7c   :  { %630 = vsyncadd [#allocation7], 4294967024 }
  0x7d   :  { %631 = dma.done.wait [#allocation10], 528  }
  0x7e   :  { %632 = vsyncadd [#allocation10], 4294966768 }
  0x7f   :  { %633 = dma.done.wait [#allocation13], 32  }
  0x80   :  { %634 = vsyncadd [#allocation13], 4294967264  ;;  %vm119_vm0 = vcmask 261120   ;;  %v646_v0 = vmov 0.0   ;;  %vm647_vm1 = vmmov 0   ;;  %v440_v1 = vld [vmem:[#allocation6] sm:$0xff]  }
  0x81   :  { %408 = vmatprep.subr.bf16.mxu0 %v646_v0  ;;  %412 = vmatprep.mubr.msk.bf16.mxu0 %vm647_vm1, %v646_v0  ;;  %120 = vst.msk [vmem:[#allocation2] sm:$0xff] %vm119_vm0, %v646_v0  ;;  %121 = vst.msk [vmem:[#allocation2 + $0x8] sm:$0xff] %vm119_vm0, %v646_v0  ;;  %v441_v2 = vld [vmem:[#allocation6 + $0x8] sm:$0xff]   ;;  %v443_v3 = vld [vmem:[#allocation9] sm:$0xff]   ;;  %vm234_vm2 = vcmask 523264   ;;  %vm356_vm3 = vcmask 257024  }
  0x82   :  { %416 = vmatprep.subr.bf16.mxu1 %v646_v0  ;;  %424 = vmatprep.mubr.msk.bf16.mxu1 %vm647_vm1, %v646_v0  ;;  %v442_v4 = vld [vmem:[#allocation3] sm:$0xff]   ;;  %v445_v6 = vld [vmem:[#allocation9 + $0x10] sm:$0xff]   ;;  %v446_v7 = vld [vmem:[#allocation9 + $0x18] sm:$0xff]   ;;  %s648_s6 = smov [#allocation15]  }
  0x83   :  { %409 = vmatpush3.bf16.msra.mxu0 %v440_v1  ;;  %417 = vmatpush3.bf16.msra.mxu1 %v443_v3  ;;  %v444_v5 = vld [vmem:[#allocation9 + $0x8] sm:$0xff]   ;;  %v379_v8 = vld [vmem:[#allocation8] ss:$0 sm:$0xff]  ;;  %v389_v27 = vld [vmem:[#allocation11] ss:$0 sm:$0xff]  ;;  %s364_s30 = sshll.u32 %s648_s6, 4  ;;  %s365_s30 = int_to_ptr.vmem [resolvable:$true] %s364_s30 }
  0x84   :  { %410 = vmatprep.subr.bf16.mxu0 %v646_v0  ;;  %418 = vmatprep.subr.bf16.mxu1 %v646_v0  ;;  %v397_v26 = vld [vmem:[#allocation3] sm:$0xff]   ;;  %v390_v55 = vld [vmem:[#allocation12] ss:$0 sm:$0xff]  ;;  %v391_v57 = vld [vmem:[#allocation14] ss:$0 sm:$0xff]  ;;  %s605_s17 = scalar_lea.vmem %s365_s30, 128  ;;  %p610_p1 = scmp.lt.s32.totalorder %s365_s30, %s365_s30 }
  0x85   :  { %v398_v28 = vunpack.c.l.bf16 %v397_v26  ;;  %v399_v31 = vunpack.c.h.bf16 %v397_v26  ;;  %p606_p0 = scmp.ne.s32.totalorder %s365_s30, %s605_s17  ;;  %p611_p2 = scmp.lt.s32.totalorder %s605_s17, %s605_s17 }
  0x87   :  { %411 = vmatpush3.bf16.msra.mxu0 %v441_v2  ;;  %419 = vmatpush3.bf16.msra.mxu1 %v444_v5  ;;  %p612_p3 = por %p611_p2, %p610_p1 }
  0x88   :  { %420 = vmatprep.subr.bf16.mxu1 %v646_v0  ;;  %v199_v18 = vld [vmem:[#allocation2] sm:$0xff]  ;;  %v200_v20 = vld [vmem:[#allocation2 + $0x8] sm:$0xff] }
  0x89   :  { %p613_p4 = pnand %p612_p3, %p606_p0 }
  0x8a   :  { %413 = vmatmul.mubr.msk.bf16.vlgmr.msra.gmra.mrb[0].mxu0 %vm119_vm0, %v442_v4 }
  0x8b   :  { %421 = vmatpush3.bf16.msra.mxu1 %v445_v6 }
  0x8c   :  { %422 = vmatprep.subr.bf16.mxu1 %v646_v0 }
  0x8f   :  { %423 = vmatpush3.bf16.msra.mxu1 %v446_v7 }
 0x15d   :  { %v190_v9 = vpop.f32.mrb[0].mxu0 }
 0x15e   :  { %v191_v10 = vadd.f32 %v379_v8, %v190_v9  ;;  %v414_v11 = vpop.f32.mrb[1].mxu0 }
 0x15f   :  { %v193_v12 = vpop.f32.mrb[2].mxu0 }
 0x160   :  { %v194_v13 = vadd.f32 %v379_v8, %v193_v12  ;;  %v415_v14 = vpop.f32.mrb[3].mxu0  ;;  %v197_v15 = vmax.f32 %v191_v10, 0.0 }
 0x162   :  { %v198_v16 = vmax.f32 %v194_v13, 0.0 }
 0x164   :  { %v201_v17 = vpack.c.bf16 %v198_v16, %v197_v15 }
 0x166   :  { %425 = vmatmul.mubr.msk.bf16.vlgmr.msra.gmra.mrb[0].mxu1 %vm234_vm2, %v201_v17 }
 0x239   :  { %v272_v19 = vpop.f32.mrb[0].mxu1 }
 0x23a   :  { %v279_v21 = vadd.f32 %v272_v19, %v199_v18  ;;  %v426_v22 = vpop.f32.mrb[1].mxu1 }
 0x23b   :  { %v275_v23 = vpop.f32.mrb[2].mxu1 }
 0x23c   :  { %281 = vst.msk [vmem:[#allocation2] sm:$0xff] %vm119_vm0, %v279_v21  ;;  %v280_v24 = vadd.f32 %v275_v23, %v200_v20  ;;  %v427_v25 = vpop.f32.mrb[3].mxu1 }
 0x23e   :  { %282 = vst.msk [vmem:[#allocation2 + $0x8] sm:$0xff] %vm119_vm0, %v280_v24 }
 0x243   :  { %v286_v29 = vld [vmem:[#allocation2] sm:$0xff] }
 0x244   :  { %v295_v30 = vadd.f32 %v389_v27, %v286_v29 }
 0x245   :  { %v287_v32 = vld [vmem:[#allocation2 + $0x8] sm:$0xff] }
 0x246   :  { %v301_v33 = vadd.f32 %v398_v28, %v295_v30  ;;  %v296_v34 = vadd.f32 %v389_v27, %v287_v32 }
 0x248   :  { %v303_v35 = vsel %vm119_vm0, %v301_v33, 0.0  ;;  %v302_v36 = vadd.f32 %v399_v31, %v296_v34 }
 0x249   :  { %304 = vadd.xlane.f32.xlu0 %v303_v35 }
 0x24a   :  { %v306_v37 = vsel %vm119_vm0, %v302_v36, 0.0 }
 0x24d   :  { %307 = vadd.xlane.f32.xlu0 %v306_v37 }
 0x2d6   :  { %v305_v38 = vpop.xlane.xlu0 %304 }
 0x2d7   :  { %v310_v39 = vmul.f32 0.03125, %v305_v38 }
 0x2d9   :  { %v312_v40 = vsub.f32 %v301_v33, %v310_v39 }
 0x2da   :  { %v308_v41 = vpop.xlane.xlu0 %307 }
 0x2db   :  { %v311_v42 = vmul.f32 0.03125, %v308_v41  ;;  %v314_v43 = vmul.f32 %v312_v40, %v312_v40 }
 0x2dd   :  { %v313_v44 = vsub.f32 %v302_v36, %v311_v42  ;;  %v316_v45 = vsel %vm119_vm0, %v314_v43, 0.0 }
 0x2de   :  { %317 = vadd.xlane.f32.xlu1 %v316_v45 }
 0x2df   :  { %v315_v46 = vmul.f32 %v313_v44, %v313_v44 }
 0x2e1   :  { %v319_v47 = vsel %vm119_vm0, %v315_v46, 0.0 }
 0x2e2   :  { %320 = vadd.xlane.f32.xlu1 %v319_v47 }
 0x36b   :  { %v318_v48 = vpop.xlane.xlu1 %317 }
 0x36c   :  { %v322_v49 = vmul.f32 0.03125, %v318_v48 }
 0x36e   :  { %v324_v50 = vadd.f32 1e-05, %v322_v49 }
 0x36f   :  { %v321_v51 = vpop.xlane.xlu1 %320 }
 0x370   :  { %447 = vrsqrt.f32 %v324_v50  ;;  %v323_v52 = vmul.f32 0.03125, %v321_v51 }
 0x372   :  { %v325_v53 = vadd.f32 1e-05, %v323_v52 }
 0x374   :  { %449 = vrsqrt.f32 %v325_v53 }
 0x37a   :  { %v448_v54 = vpop.eup %447 }
 0x37b   :  { %v328_v56 = vmul.f32 %v448_v54, %v312_v40 }
 0x37d   :  { %v337_v58 = vmul.f32 %v390_v55, %v328_v56 }
 0x37e   :  { %v450_v59 = vpop.eup %449 }
 0x37f   :  { %v329_v60 = vmul.f32 %v450_v59, %v313_v44  ;;  %v346_v61 = vadd.f32 %v391_v57, %v337_v58 }
 0x381   :  { %v338_v62 = vmul.f32 %v390_v55, %v329_v60  ;;  %v394_v63 = vpack.c.bf16 %v346_v61, %v346_v61 }
 0x383   :  { %v347_v0 = vadd.f32 %v391_v57, %v338_v62  ;;  %357 = vst.msk [vmem:[#allocation15] sm:$0xf] %vm356_vm3, %v394_v63 }
 0x385   :  { %v395_v1 = vpack.c.bf16 %v347_v0, %v347_v0 }
 0x387   :  { %358 = vst.msk [vmem:[#allocation15 + $0x4] sm:$0xf] %vm356_vm3, %v395_v1 }
 0x388   :  { %616 = shalt.err (!%p613_p4)
}
 0x389   :  { %s617_s20 = scalar_lea.hbm %s827_s7, 128 }
 0x38a   :  { %p618_p5 = scmp.ne.s32.totalorder %s827_s7, %s617_s20  ;;  %p621_p6 = scmp.lt.u32.totalorder %s617_s20, %s827_s7 }
 0x38c   :  { %p623_p7 = pnand %p621_p6, %p618_p5 }
 0x38e   :  { %626 = shalt.err (!%p623_p7)
}
 0x38f   :  { %370 = dma.vmem_to_hbm [thread:$0]  %s365_s30, 128, %s827_s7, [#allocation5], %s639_s13, %s639_s13, %s640_s14  }
 0x390   :  { %635 = dma.done.wait [#allocation5], 128  }
 0x391   :  { %636 = vsyncadd [#allocation5], 4294967168 }
 0x392   :  { %374 = vsyncpa [#allocation4], 1 }
 0x393   :  { %375 = vsyncpa [#allocation7], 1 }
 0x394   :  { %376 = vsyncpa [#allocation10], 1 }
 0x395   :  { %377 = vsyncpa [#allocation13], 1 }
 0x396   :  { %378 = vsyncpa [#allocation5], 1 }

</bundles_post_ra>
